<compile_context>
chip_gen: v7x
topology: tpu7x:2x2x1
jax: 0.10.0
libtpu: 0.0.40
codegen_flags: <defaults>
</compile_context>

<pallas_src>
import numpy as np

import jax
import jax.numpy as jnp
from jax.experimental import pallas as pl
from jax.experimental.pallas import tpu as pltpu


# ---------------------------------------------------------------------------
# Host-side weight matricization (runs once, outside the kernel).
# ---------------------------------------------------------------------------
def _matricize_conv(w, H, W):
    """Banded-matrix form of a 'same' 3-D conv with H/W padding folded in.

    w: (K, K, K, Cin, Cout) cross-correlation weights.
    Returns B: (K, H*W*Cin, H*W*Cout) float32 such that, with
        xf[d, (h*W + w)*Cin + ci]  = x[d, h, w, ci]
        yf[d, (h*W + w)*Cout + co] = y[d, h, w, co]
    and xpadD = xf zero-padded by K//2 rows along d only,
        yf = sum_kd  xpadD[kd:kd+D, :] @ B[kd].
    """
    K, _, _, Cin, Cout = w.shape
    p = K // 2
    w = np.asarray(w, np.float32)
    B = np.zeros((K, H, W, Cin, H, W, Cout), np.float32)
    for kd in range(K):
        for kh in range(K):
            for kw in range(K):
                wk = w[kd, kh, kw]                       # (Cin, Cout)
                for h in range(H):
                    hi = h + kh - p
                    if hi < 0 or hi >= H:
                        continue                          # folded zero padding
                    for ww in range(W):
                        wi = ww + kw - p
                        if wi < 0 or wi >= W:
                            continue                      # folded zero padding
                        B[kd, hi, wi, :, h, ww, :] = wk
    return B.reshape(K, H * W * Cin, H * W * Cout)


def prepare_block_params(params, kernel_sizes, H, W, out_channels):
    """Canonical conv params -> bf16 banded slabs + f32 bias rows."""
    prepared = []
    for k, prm in zip(kernel_sizes, params):
        # 'same' conv with padding = k // 2 only matches PyTorch for odd k.
        assert k % 2 == 1, "PyramidConvBlock assumes odd kernel sizes"
        b1_row = np.tile(np.asarray(prm["b1"], np.float32), H * W)[None, :]
        b2_row = np.tile(np.asarray(prm["b2"], np.float32), H * W)[None, :]
        prepared.append(dict(
            B1=jnp.asarray(_matricize_conv(prm["w1"], H, W), jnp.bfloat16),
            b1=jnp.asarray(b1_row),
            B2=jnp.asarray(_matricize_conv(prm["w2"], H, W), jnp.bfloat16),
            b2=jnp.asarray(b2_row),
        ))
    return prepared


# ---------------------------------------------------------------------------
# Fused Pallas kernel (single invocation, whole arrays resident in VMEM).
# ---------------------------------------------------------------------------
def _build_kernel(kernel_sizes, N, D, w_in, w_mid):
    n_paths = len(kernel_sizes)

    def kernel(*refs):
        x_ref = refs[0]                               # (N*D, w_in)  bf16
        param_refs = refs[1:1 + 4 * n_paths]
        o_ref = refs[1 + 4 * n_paths]                 # (N*D, n_paths*w_mid)
        scratch_refs = refs[2 + 4 * n_paths:]

        s = 0
        for path, k in enumerate(kernel_sizes):
            B1_ref, b1_ref, B2_ref, b2_ref = param_refs[4 * path:4 * path + 4]
            col0 = path * w_mid
            p = k // 2

            if p == 0:
                # 1x1x1 convs: plain dense matmuls over all N*D rows.
                h1 = jnp.dot(x_ref[...], B1_ref[0],
                             preferred_element_type=jnp.float32)
                h1 = jnp.maximum(h1 + b1_ref[...], 0.0)
                y = jnp.dot(h1.astype(jnp.bfloat16), B2_ref[0],
                            preferred_element_type=jnp.float32)
                y = jnp.maximum(y + b2_ref[...], 0.0)
                o_ref[:, col0:col0 + w_mid] = y.astype(o_ref.dtype)
                continue

            pad1, pad2 = scratch_refs[s], scratch_refs[s + 1]
            s += 2
            Dp = D + 2 * p                  # padded depth per sample
            M_ext = N * Dp - 2 * p          # rows per banded matmul

            # Zero only the boundary / inter-sample separator rows of the
            # D-padded scratches; data rows are overwritten below.
            for n in range(N):
                pad1[n * Dp:n * Dp + p, :] = jnp.zeros((p, w_in), pad1.dtype)
                pad1[n * Dp + p + D:(n + 1) * Dp, :] = jnp.zeros((p, w_in),
                                                                 pad1.dtype)
                pad2[n * Dp:n * Dp + p, :] = jnp.zeros((p, w_mid), pad2.dtype)
                pad2[n * Dp + p + D:(n + 1) * Dp, :] = jnp.zeros((p, w_mid),
                                                                 pad2.dtype)
                pad1[n * Dp + p:n * Dp + p + D, :] = x_ref[n * D:(n + 1) * D, :]

            # Layer 1: Conv3d as K banded bf16 matmuls, f32 accumulation.
            acc1 = jnp.dot(pad1[0:M_ext, :], B1_ref[0],
                           preferred_element_type=jnp.float32)
            for kd in range(1, k):
                acc1 = acc1 + jnp.dot(pad1[kd:kd + M_ext, :], B1_ref[kd],
                                      preferred_element_type=jnp.float32)
            h1 = jnp.maximum(acc1 + b1_ref[...], 0.0).astype(jnp.bfloat16)

            # Scatter the valid rows (sample-boundary junk rows are dropped)
            # into the D-padded scratch for layer 2.
            for n in range(N):
                pad2[n * Dp + p:n * Dp + p + D, :] = h1[n * Dp:n * Dp + D, :]

            # Layer 2: Conv3d (per-path output width, no zero columns).
            acc2 = jnp.dot(pad2[0:M_ext, :], B2_ref[0],
                           preferred_element_type=jnp.float32)
            for kd in range(1, k):
                acc2 = acc2 + jnp.dot(pad2[kd:kd + M_ext, :], B2_ref[kd],
                                      preferred_element_type=jnp.float32)
            y = jnp.maximum(acc2 + b2_ref[...], 0.0)

            # Aligned (8-sublane, 128-lane) stores into this path's columns.
            for n in range(N):
                o_ref[n * D:(n + 1) * D, col0:col0 + w_mid] = \
                    y[n * Dp:n * Dp + D, :].astype(o_ref.dtype)

    return kernel


def pyramid_conv_block(x_ndhwc, prepared, kernel_sizes, out_channels):
    """Forward pass of PyramidConvBlock on NDHWC input (one fused kernel)."""
    N, D, H, W, Cin = x_ndhwc.shape
    n_paths = len(kernel_sizes)
    c_total = n_paths * out_channels
    w_in = H * W * Cin
    w_mid = H * W * out_channels

    # Lane-density / tiling sanity (avoid silently falling into masked-store
    # or relayout paths for other configs).
    assert w_in % 128 == 0 and w_mid % 128 == 0, \
        "flattened H*W*C widths must be multiples of 128 lanes"
    assert D % 8 == 0, "D must be a multiple of 8 sublanes for aligned stores"

    # NDHWC -> (N*D, H*W*Cin); bf16 LHS for MXU-native matmuls.
    x2 = x_ndhwc.reshape(N * D, w_in).astype(jnp.bfloat16)

    flat_params = []
    scratch_shapes = []
    for k, prm in zip(kernel_sizes, prepared):
        flat_params += [prm["B1"], prm["b1"], prm["B2"], prm["b2"]]
        p = k // 2
        if p > 0:
            Dp = D + 2 * p
            scratch_shapes += [pltpu.VMEM((N * Dp, w_in), jnp.bfloat16),
                               pltpu.VMEM((N * Dp, w_mid), jnp.bfloat16)]

    out2 = pl.pallas_call(
        _build_kernel(kernel_sizes, N, D, w_in, w_mid),
        out_shape=jax.ShapeDtypeStruct((N * D, n_paths * w_mid),
                                       x_ndhwc.dtype),
        scratch_shapes=scratch_shapes,
    )(x2, *flat_params)

    # torch.cat channel interleave as a cheap wrapper reshape/transpose.
    out = out2.reshape(N, D, n_paths, H, W, out_channels)
    out = jnp.transpose(out, (0, 1, 3, 4, 2, 5))
    return out.reshape(N, D, H, W, c_total)


# ---------------------------------------------------------------------------
# Parameters + pure-JAX reference.
# ---------------------------------------------------------------------------
def init_params(key, in_channels, out_channels, kernel_sizes):
    params = []
    for k in kernel_sizes:
        key, k1, k2, k3, k4 = jax.random.split(key, 5)
        scale1 = 1.0 / np.sqrt(in_channels * k * k * k)
        scale2 = 1.0 / np.sqrt(out_channels * k * k * k)
        params.append(
            dict(
                w1=jax.random.uniform(
                    k1, (k, k, k, in_channels, out_channels), jnp.float32,
                    minval=-scale1, maxval=scale1),
                b1=jax.random.uniform(
                    k2, (out_channels,), jnp.float32,
                    minval=-scale1, maxval=scale1),
                w2=jax.random.uniform(
                    k3, (k, k, k, out_channels, out_channels), jnp.float32,
                    minval=-scale2, maxval=scale2),
                b2=jax.random.uniform(
                    k4, (out_channels,), jnp.float32,
                    minval=-scale2, maxval=scale2),
            )
        )
    return params


def _reference_conv3d_bias_relu(x, w, b, k):
    p = k // 2
    y = jax.lax.conv_general_dilated(
        x, w, window_strides=(1, 1, 1),
        padding=[(p, p)] * 3,
        dimension_numbers=("NDHWC", "DHWIO", "NDHWC"),
        precision=jax.lax.Precision.HIGHEST,
    )
    return jnp.maximum(y + b, 0.0)


def _reference_block(x, params, kernel_sizes):
    outs = []
    for k, p in zip(kernel_sizes, params):
        h = _reference_conv3d_bias_relu(x, p["w1"], p["b1"], k)
        h = _reference_conv3d_bias_relu(h, p["w2"], p["b2"], k)
        outs.append(h)
    return jnp.maximum(jnp.concatenate(outs, axis=-1), 0.0)


if __name__ == "__main__":
    key = jax.random.PRNGKey(0)
    key, xkey, pkey = jax.random.split(key, 3)

    # Module config (small, consistent with the PyTorch module's __init__).
    in_channels = 4
    out_channels = 4
    kernel_sizes = (1, 3)
    N, D, H, W = 2, 8, 8, 8

    # PyTorch-style NCDHW input, transposed to the kernel's NDHWC layout.
    x_ncdhw = jax.random.normal(xkey, (N, in_channels, D, H, W), jnp.float32)
    x_ndhwc = jnp.transpose(x_ncdhw, (0, 2, 3, 4, 1))

    params = init_params(pkey, in_channels, out_channels, kernel_sizes)
    prepared = prepare_block_params(params, kernel_sizes, H, W, out_channels)

    out = pyramid_conv_block(x_ndhwc, prepared, kernel_sizes, out_channels)
    out = jax.block_until_ready(out)

    expected_shape = (N, D, H, W, out_channels * len(kernel_sizes))
    assert out.shape == expected_shape, (out.shape, expected_shape)

    ref = jax.block_until_ready(_reference_block(x_ndhwc, params, kernel_sizes))
    # bf16 operands (f32 accumulation) vs. f32 HIGHEST-precision reference.
    np.testing.assert_allclose(np.asarray(out), np.asarray(ref),
                               rtol=2e-2, atol=2e-2)

    print("KERNEL_OK")
</pallas_src>

<mosaic_0001>
module attributes {stable_mosaic.version = 11 : i64} {
  func.func @kernel(%arg0: memref<16x256xbf16, #tpu.memory_space<vmem>>, %arg1: memref<1x256x256xbf16, #tpu.memory_space<vmem>>, %arg2: memref<1x256xf32, #tpu.memory_space<vmem>>, %arg3: memref<1x256x256xbf16, #tpu.memory_space<vmem>>, %arg4: memref<1x256xf32, #tpu.memory_space<vmem>>, %arg5: memref<3x256x256xbf16, #tpu.memory_space<vmem>>, %arg6: memref<1x256xf32, #tpu.memory_space<vmem>>, %arg7: memref<3x256x256xbf16, #tpu.memory_space<vmem>>, %arg8: memref<1x256xf32, #tpu.memory_space<vmem>>, %arg9: memref<16x512xf32, #tpu.memory_space<vmem>>, %arg10: memref<20x256xbf16, #tpu.memory_space<vmem>>, %arg11: memref<20x256xbf16, #tpu.memory_space<vmem>>) attributes {dimension_semantics = [], scalar_prefetch = 0 : i64, scratch_operands = 2 : i64, tpu.core_type = #tpu.core_type<tc>} {
    %c0 = arith.constant 0 : index
    %c0_0 = arith.constant 0 : index
    %0 = vector.load %arg0[%c0, %c0_0] : memref<16x256xbf16, #tpu.memory_space<vmem>>, vector<16x256xbf16>
    %c0_1 = arith.constant 0 : index
    %c0_2 = arith.constant 0 : index
    %c0_3 = arith.constant 0 : index
    %1 = vector.load %arg1[%c0_1, %c0_2, %c0_3] : memref<1x256x256xbf16, #tpu.memory_space<vmem>>, vector<1x256x256xbf16>
    %2 = vector.shape_cast %1 : vector<1x256x256xbf16> to vector<256x256xbf16>
    %cst = arith.constant dense<0.000000e+00> : vector<16x256xf32>
    %3 = tpu.matmul %0, %2, %cst {dimension_numbers = #tpu.dot_dimension_numbers<[1], [0], [0], [1], [0, 0, 1, 1], [], []>} : vector<16x256xbf16>, vector<256x256xbf16>, vector<16x256xf32> -> vector<16x256xf32>
    %c0_4 = arith.constant 0 : index
    %c0_5 = arith.constant 0 : index
    %4 = vector.load %arg2[%c0_4, %c0_5] : memref<1x256xf32, #tpu.memory_space<vmem>>, vector<1x256xf32>
    %5 = vector.broadcast %4 : vector<1x256xf32> to vector<16x256xf32>
    %6 = arith.addf %3, %5 : vector<16x256xf32>
    %cst_6 = arith.constant 0.000000e+00 : f32
    %7 = vector.broadcast %cst_6 : f32 to vector<16x256xf32>
    %8 = arith.maximumf %6, %7 : vector<16x256xf32>
    %9 = arith.truncf %8 : vector<16x256xf32> to vector<16x256xbf16>
    %c0_7 = arith.constant 0 : index
    %c0_8 = arith.constant 0 : index
    %c0_9 = arith.constant 0 : index
    %10 = vector.load %arg3[%c0_7, %c0_8, %c0_9] : memref<1x256x256xbf16, #tpu.memory_space<vmem>>, vector<1x256x256xbf16>
    %11 = vector.shape_cast %10 : vector<1x256x256xbf16> to vector<256x256xbf16>
    %cst_10 = arith.constant dense<0.000000e+00> : vector<16x256xf32>
    %12 = tpu.matmul %9, %11, %cst_10 {dimension_numbers = #tpu.dot_dimension_numbers<[1], [0], [0], [1], [0, 0, 1, 1], [], []>} : vector<16x256xbf16>, vector<256x256xbf16>, vector<16x256xf32> -> vector<16x256xf32>
    %c0_11 = arith.constant 0 : index
    %c0_12 = arith.constant 0 : index
    %13 = vector.load %arg4[%c0_11, %c0_12] : memref<1x256xf32, #tpu.memory_space<vmem>>, vector<1x256xf32>
    %14 = vector.broadcast %13 : vector<1x256xf32> to vector<16x256xf32>
    %15 = arith.addf %12, %14 : vector<16x256xf32>
    %cst_13 = arith.constant 0.000000e+00 : f32
    %16 = vector.broadcast %cst_13 : f32 to vector<16x256xf32>
    %17 = arith.maximumf %15, %16 : vector<16x256xf32>
    %c0_14 = arith.constant 0 : index
    %c0_15 = arith.constant 0 : index
    %18 = vector.load %arg9[%c0_14, %c0_15] : memref<16x512xf32, #tpu.memory_space<vmem>>, vector<16x256xf32>
    tpu.vector_store %arg9[%c0_14, %c0_15], %17 {strides = array<i32>} : memref<16x512xf32, #tpu.memory_space<vmem>>, vector<16x256xf32>,
    %cst_16 = arith.constant 0.000000e+00 : bf16
    %19 = vector.broadcast %cst_16 : bf16 to vector<1x256xbf16>
    %c0_17 = arith.constant 0 : index
    %c0_18 = arith.constant 0 : index
    %20 = vector.load %arg10[%c0_17, %c0_18] : memref<20x256xbf16, #tpu.memory_space<vmem>>, vector<1x256xbf16>
    tpu.vector_store %arg10[%c0_17, %c0_18], %19 {strides = array<i32>} : memref<20x256xbf16, #tpu.memory_space<vmem>>, vector<1x256xbf16>,
    %cst_19 = arith.constant 0.000000e+00 : bf16
    %21 = vector.broadcast %cst_19 : bf16 to vector<1x256xbf16>
    %c9 = arith.constant 9 : index
    %c0_20 = arith.constant 0 : index
    %22 = vector.load %arg10[%c9, %c0_20] : memref<20x256xbf16, #tpu.memory_space<vmem>>, vector<1x256xbf16>
    tpu.vector_store %arg10[%c9, %c0_20], %21 {strides = array<i32>} : memref<20x256xbf16, #tpu.memory_space<vmem>>, vector<1x256xbf16>,
    %cst_21 = arith.constant 0.000000e+00 : bf16
    %23 = vector.broadcast %cst_21 : bf16 to vector<1x256xbf16>
    %c0_22 = arith.constant 0 : index
    %c0_23 = arith.constant 0 : index
    %24 = vector.load %arg11[%c0_22, %c0_23] : memref<20x256xbf16, #tpu.memory_space<vmem>>, vector<1x256xbf16>
    tpu.vector_store %arg11[%c0_22, %c0_23], %23 {strides = array<i32>} : memref<20x256xbf16, #tpu.memory_space<vmem>>, vector<1x256xbf16>,
    %cst_24 = arith.constant 0.000000e+00 : bf16
    %25 = vector.broadcast %cst_24 : bf16 to vector<1x256xbf16>
    %c9_25 = arith.constant 9 : index
    %c0_26 = arith.constant 0 : index
    %26 = vector.load %arg11[%c9_25, %c0_26] : memref<20x256xbf16, #tpu.memory_space<vmem>>, vector<1x256xbf16>
    tpu.vector_store %arg11[%c9_25, %c0_26], %25 {strides = array<i32>} : memref<20x256xbf16, #tpu.memory_space<vmem>>, vector<1x256xbf16>,
    %c0_27 = arith.constant 0 : index
    %c0_28 = arith.constant 0 : index
    %27 = vector.load %arg0[%c0_27, %c0_28] : memref<16x256xbf16, #tpu.memory_space<vmem>>, vector<8x256xbf16>
    %c1 = arith.constant 1 : index
    %c0_29 = arith.constant 0 : index
    %28 = vector.load %arg10[%c1, %c0_29] : memref<20x256xbf16, #tpu.memory_space<vmem>>, vector<8x256xbf16>
    tpu.vector_store %arg10[%c1, %c0_29], %27 {strides = array<i32>} : memref<20x256xbf16, #tpu.memory_space<vmem>>, vector<8x256xbf16>,
    %cst_30 = arith.constant 0.000000e+00 : bf16
    %29 = vector.broadcast %cst_30 : bf16 to vector<1x256xbf16>
    %c10 = arith.constant 10 : index
    %c0_31 = arith.constant 0 : index
    %30 = vector.load %arg10[%c10, %c0_31] : memref<20x256xbf16, #tpu.memory_space<vmem>>, vector<1x256xbf16>
    tpu.vector_store %arg10[%c10, %c0_31], %29 {strides = array<i32>} : memref<20x256xbf16, #tpu.memory_space<vmem>>, vector<1x256xbf16>,
    %cst_32 = arith.constant 0.000000e+00 : bf16
    %31 = vector.broadcast %cst_32 : bf16 to vector<1x256xbf16>
    %c19 = arith.constant 19 : index
    %c0_33 = arith.constant 0 : index
    %32 = vector.load %arg10[%c19, %c0_33] : memref<20x256xbf16, #tpu.memory_space<vmem>>, vector<1x256xbf16>
    tpu.vector_store %arg10[%c19, %c0_33], %31 {strides = array<i32>} : memref<20x256xbf16, #tpu.memory_space<vmem>>, vector<1x256xbf16>,
    %cst_34 = arith.constant 0.000000e+00 : bf16
    %33 = vector.broadcast %cst_34 : bf16 to vector<1x256xbf16>
    %c10_35 = arith.constant 10 : index
    %c0_36 = arith.constant 0 : index
    %34 = vector.load %arg11[%c10_35, %c0_36] : memref<20x256xbf16, #tpu.memory_space<vmem>>, vector<1x256xbf16>
    tpu.vector_store %arg11[%c10_35, %c0_36], %33 {strides = array<i32>} : memref<20x256xbf16, #tpu.memory_space<vmem>>, vector<1x256xbf16>,
    %cst_37 = arith.constant 0.000000e+00 : bf16
    %35 = vector.broadcast %cst_37 : bf16 to vector<1x256xbf16>
    %c19_38 = arith.constant 19 : index
    %c0_39 = arith.constant 0 : index
    %36 = vector.load %arg11[%c19_38, %c0_39] : memref<20x256xbf16, #tpu.memory_space<vmem>>, vector<1x256xbf16>
    tpu.vector_store %arg11[%c19_38, %c0_39], %35 {strides = array<i32>} : memref<20x256xbf16, #tpu.memory_space<vmem>>, vector<1x256xbf16>,
    %c8 = arith.constant 8 : index
    %c0_40 = arith.constant 0 : index
    %37 = vector.load %arg0[%c8, %c0_40] : memref<16x256xbf16, #tpu.memory_space<vmem>>, vector<8x256xbf16>
    %c11 = arith.constant 11 : index
    %c0_41 = arith.constant 0 : index
    %38 = vector.load %arg10[%c11, %c0_41] : memref<20x256xbf16, #tpu.memory_space<vmem>>, vector<8x256xbf16>
    tpu.vector_store %arg10[%c11, %c0_41], %37 {strides = array<i32>} : memref<20x256xbf16, #tpu.memory_space<vmem>>, vector<8x256xbf16>,
    %c0_42 = arith.constant 0 : index
    %c0_43 = arith.constant 0 : index
    %39 = vector.load %arg10[%c0_42, %c0_43] : memref<20x256xbf16, #tpu.memory_space<vmem>>, vector<18x256xbf16>
    %c0_44 = arith.constant 0 : index
    %c0_45 = arith.constant 0 : index
    %c0_46 = arith.constant 0 : index
    %40 = vector.load %arg5[%c0_44, %c0_45, %c0_46] : memref<3x256x256xbf16, #tpu.memory_space<vmem>>, vector<1x256x256xbf16>
    %41 = vector.shape_cast %40 : vector<1x256x256xbf16> to vector<256x256xbf16>
    %cst_47 = arith.constant dense<0.000000e+00> : vector<18x256xf32>
    %42 = tpu.matmul %39, %41, %cst_47 {dimension_numbers = #tpu.dot_dimension_numbers<[1], [0], [0], [1], [0, 0, 1, 1], [], []>} : vector<18x256xbf16>, vector<256x256xbf16>, vector<18x256xf32> -> vector<18x256xf32>
    %c1_48 = arith.constant 1 : index
    %c0_49 = arith.constant 0 : index
    %43 = vector.load %arg10[%c1_48, %c0_49] : memref<20x256xbf16, #tpu.memory_space<vmem>>, vector<18x256xbf16>
    %c1_50 = arith.constant 1 : index
    %c0_51 = arith.constant 0 : index
    %c0_52 = arith.constant 0 : index
    %44 = vector.load %arg5[%c1_50, %c0_51, %c0_52] : memref<3x256x256xbf16, #tpu.memory_space<vmem>>, vector<1x256x256xbf16>
    %45 = vector.shape_cast %44 : vector<1x256x256xbf16> to vector<256x256xbf16>
    %cst_53 = arith.constant dense<0.000000e+00> : vector<18x256xf32>
    %46 = tpu.matmul %43, %45, %cst_53 {dimension_numbers = #tpu.dot_dimension_numbers<[1], [0], [0], [1], [0, 0, 1, 1], [], []>} : vector<18x256xbf16>, vector<256x256xbf16>, vector<18x256xf32> -> vector<18x256xf32>
    %47 = arith.addf %42, %46 : vector<18x256xf32>
    %c2 = arith.constant 2 : index
    %c0_54 = arith.constant 0 : index
    %48 = vector.load %arg10[%c2, %c0_54] : memref<20x256xbf16, #tpu.memory_space<vmem>>, vector<18x256xbf16>
    %c2_55 = arith.constant 2 : index
    %c0_56 = arith.constant 0 : index
    %c0_57 = arith.constant 0 : index
    %49 = vector.load %arg5[%c2_55, %c0_56, %c0_57] : memref<3x256x256xbf16, #tpu.memory_space<vmem>>, vector<1x256x256xbf16>
    %50 = vector.shape_cast %49 : vector<1x256x256xbf16> to vector<256x256xbf16>
    %cst_58 = arith.constant dense<0.000000e+00> : vector<18x256xf32>
    %51 = tpu.matmul %48, %50, %cst_58 {dimension_numbers = #tpu.dot_dimension_numbers<[1], [0], [0], [1], [0, 0, 1, 1], [], []>} : vector<18x256xbf16>, vector<256x256xbf16>, vector<18x256xf32> -> vector<18x256xf32>
    %52 = arith.addf %47, %51 : vector<18x256xf32>
    %c0_59 = arith.constant 0 : index
    %c0_60 = arith.constant 0 : index
    %53 = vector.load %arg6[%c0_59, %c0_60] : memref<1x256xf32, #tpu.memory_space<vmem>>, vector<1x256xf32>
    %54 = vector.broadcast %53 : vector<1x256xf32> to vector<18x256xf32>
    %55 = arith.addf %52, %54 : vector<18x256xf32>
    %cst_61 = arith.constant 0.000000e+00 : f32
    %56 = vector.broadcast %cst_61 : f32 to vector<18x256xf32>
    %57 = arith.maximumf %55, %56 : vector<18x256xf32>
    %58 = arith.truncf %57 : vector<18x256xf32> to vector<18x256xbf16>
    %59 = vector.extract_strided_slice %58 {offsets = [0, 0], sizes = [8, 256], strides = [1, 1]} : vector<18x256xbf16> to vector<8x256xbf16>
    %c1_62 = arith.constant 1 : index
    %c0_63 = arith.constant 0 : index
    %60 = vector.load %arg11[%c1_62, %c0_63] : memref<20x256xbf16, #tpu.memory_space<vmem>>, vector<8x256xbf16>
    tpu.vector_store %arg11[%c1_62, %c0_63], %59 {strides = array<i32>} : memref<20x256xbf16, #tpu.memory_space<vmem>>, vector<8x256xbf16>,
    %61 = vector.extract_strided_slice %58 {offsets = [10, 0], sizes = [8, 256], strides = [1, 1]} : vector<18x256xbf16> to vector<8x256xbf16>
    %c11_64 = arith.constant 11 : index
    %c0_65 = arith.constant 0 : index
    %62 = vector.load %arg11[%c11_64, %c0_65] : memref<20x256xbf16, #tpu.memory_space<vmem>>, vector<8x256xbf16>
    tpu.vector_store %arg11[%c11_64, %c0_65], %61 {strides = array<i32>} : memref<20x256xbf16, #tpu.memory_space<vmem>>, vector<8x256xbf16>,
    %c0_66 = arith.constant 0 : index
    %c0_67 = arith.constant 0 : index
    %63 = vector.load %arg11[%c0_66, %c0_67] : memref<20x256xbf16, #tpu.memory_space<vmem>>, vector<18x256xbf16>
    %c0_68 = arith.constant 0 : index
    %c0_69 = arith.constant 0 : index
    %c0_70 = arith.constant 0 : index
    %64 = vector.load %arg7[%c0_68, %c0_69, %c0_70] : memref<3x256x256xbf16, #tpu.memory_space<vmem>>, vector<1x256x256xbf16>
    %65 = vector.shape_cast %64 : vector<1x256x256xbf16> to vector<256x256xbf16>
    %cst_71 = arith.constant dense<0.000000e+00> : vector<18x256xf32>
    %66 = tpu.matmul %63, %65, %cst_71 {dimension_numbers = #tpu.dot_dimension_numbers<[1], [0], [0], [1], [0, 0, 1, 1], [], []>} : vector<18x256xbf16>, vector<256x256xbf16>, vector<18x256xf32> -> vector<18x256xf32>
    %c1_72 = arith.constant 1 : index
    %c0_73 = arith.constant 0 : index
    %67 = vector.load %arg11[%c1_72, %c0_73] : memref<20x256xbf16, #tpu.memory_space<vmem>>, vector<18x256xbf16>
    %c1_74 = arith.constant 1 : index
    %c0_75 = arith.constant 0 : index
    %c0_76 = arith.constant 0 : index
    %68 = vector.load %arg7[%c1_74, %c0_75, %c0_76] : memref<3x256x256xbf16, #tpu.memory_space<vmem>>, vector<1x256x256xbf16>
    %69 = vector.shape_cast %68 : vector<1x256x256xbf16> to vector<256x256xbf16>
    %cst_77 = arith.constant dense<0.000000e+00> : vector<18x256xf32>
    %70 = tpu.matmul %67, %69, %cst_77 {dimension_numbers = #tpu.dot_dimension_numbers<[1], [0], [0], [1], [0, 0, 1, 1], [], []>} : vector<18x256xbf16>, vector<256x256xbf16>, vector<18x256xf32> -> vector<18x256xf32>
    %71 = arith.addf %66, %70 : vector<18x256xf32>
    %c2_78 = arith.constant 2 : index
    %c0_79 = arith.constant 0 : index
    %72 = vector.load %arg11[%c2_78, %c0_79] : memref<20x256xbf16, #tpu.memory_space<vmem>>, vector<18x256xbf16>
    %c2_80 = arith.constant 2 : index
    %c0_81 = arith.constant 0 : index
    %c0_82 = arith.constant 0 : index
    %73 = vector.load %arg7[%c2_80, %c0_81, %c0_82] : memref<3x256x256xbf16, #tpu.memory_space<vmem>>, vector<1x256x256xbf16>
    %74 = vector.shape_cast %73 : vector<1x256x256xbf16> to vector<256x256xbf16>
    %cst_83 = arith.constant dense<0.000000e+00> : vector<18x256xf32>
    %75 = tpu.matmul %72, %74, %cst_83 {dimension_numbers = #tpu.dot_dimension_numbers<[1], [0], [0], [1], [0, 0, 1, 1], [], []>} : vector<18x256xbf16>, vector<256x256xbf16>, vector<18x256xf32> -> vector<18x256xf32>
    %76 = arith.addf %71, %75 : vector<18x256xf32>
    %c0_84 = arith.constant 0 : index
    %c0_85 = arith.constant 0 : index
    %77 = vector.load %arg8[%c0_84, %c0_85] : memref<1x256xf32, #tpu.memory_space<vmem>>, vector<1x256xf32>
    %78 = vector.broadcast %77 : vector<1x256xf32> to vector<18x256xf32>
    %79 = arith.addf %76, %78 : vector<18x256xf32>
    %cst_86 = arith.constant 0.000000e+00 : f32
    %80 = vector.broadcast %cst_86 : f32 to vector<18x256xf32>
    %81 = arith.maximumf %79, %80 : vector<18x256xf32>
    %82 = vector.extract_strided_slice %81 {offsets = [0, 0], sizes = [8, 256], strides = [1, 1]} : vector<18x256xf32> to vector<8x256xf32>
    %c0_87 = arith.constant 0 : index
    %c256 = arith.constant 256 : index
    %83 = vector.load %arg9[%c0_87, %c256] : memref<16x512xf32, #tpu.memory_space<vmem>>, vector<8x256xf32>
    tpu.vector_store %arg9[%c0_87, %c256], %82 {strides = array<i32>} : memref<16x512xf32, #tpu.memory_space<vmem>>, vector<8x256xf32>,
    %84 = vector.extract_strided_slice %81 {offsets = [10, 0], sizes = [8, 256], strides = [1, 1]} : vector<18x256xf32> to vector<8x256xf32>
    %c8_88 = arith.constant 8 : index
    %c256_89 = arith.constant 256 : index
    %85 = vector.load %arg9[%c8_88, %c256_89] : memref<16x512xf32, #tpu.memory_space<vmem>>, vector<8x256xf32>
    tpu.vector_store %arg9[%c8_88, %c256_89], %84 {strides = array<i32>} : memref<16x512xf32, #tpu.memory_space<vmem>>, vector<8x256xf32>,
    return
  }
}

</mosaic_0001>

<bundles_post_ra>
// kernel: tpu_custom_call.1
= control target key start
LH: loop header
LB: loop body
LE: loop exit
PB: predicated region body
PF: predicated region fallthrough
CT: control target
= control target key end

     0   :  { %14 = vsyncpa [#allocation5], 0  ;;  %s3798_s0 = inlined_call_operand.hbm [shape: bf16[16,256], index: 0, kind: input, shape index: {}]   ;;  %s3799_s1 = inlined_call_operand.hbm [shape: bf16[1,256,256], index: 1, kind: input, shape index: {}]   ;;  %s3800_s2 = inlined_call_operand.vmem [shape: f32[1,256], index: 2, kind: input, shape index: {}]   ;;  %s3801_s3 = inlined_call_operand.hbm [shape: bf16[1,256,256], index: 3, kind: input, shape index: {}]   ;;  %s3802_s4 = inlined_call_operand.vmem [shape: f32[1,256], index: 4, kind: input, shape index: {}]   ;;  %s3803_s5 = inlined_call_operand.hbm [shape: bf16[3,256,256], index: 5, kind: input, shape index: {}]   ;;  %s3804_s6 = inlined_call_operand.vmem [shape: f32[1,256], index: 6, kind: input, shape index: {}]   ;;  %s3805_s7 = inlined_call_operand.hbm [shape: bf16[3,256,256], index: 7, kind: input, shape index: {}]   ;;  %s3806_s8 = inlined_call_operand.vmem [shape: f32[1,256], index: 8, kind: input, shape index: {}]   ;;  %s3807_s9 = inlined_call_operand.hbm [shape: f32[16,512], index: 9, kind: output, shape index: {}]  }
   0x1   :  { %15 = vsyncpa [#allocation8], 0 }
   0x2   :  { %16 = vsyncpa [#allocation11], 0 }
   0x3   :  { %17 = vsyncpa [#allocation6], 0  ;;  %s3335_s30 = smov [#allocation7]   ;;  %s3336_s11 = smov [#allocation10]  }
   0x4   :  { %s35_s10 = sshll.u32 %s3335_s30, 4  ;;  %s63_s12 = sshll.u32 %s3336_s11, 4  ;;  %s36_s10 = int_to_ptr.vmem [resolvable:$true] %s35_s10  ;;  %s3395_s12 = int_to_ptr.vmem [resolvable:$true] %s63_s12 }
   0x5   :  { %s3195_s15 = scalar_lea.hbm %s3799_s1, 4096 }
   0x6   :  { %p3196_p0 = scmp.ne.s32.totalorder %s3799_s1, %s3195_s15  ;;  %p3199_p1 = scmp.lt.u32.totalorder %s3195_s15, %s3799_s1 }
   0x8   :  { %p3201_p2 = pnand %p3199_p1, %p3196_p0 }
   0xa   :  { %3204 = shalt.err (!%p3201_p2)
}
   0xb   :  { %s3205_s20 = scalar_lea.vmem %s36_s10, 4096  ;;  %p3210_p4 = scmp.lt.s32.totalorder %s36_s10, %s36_s10 }
   0xc   :  { %p3206_p3 = scmp.ne.s32.totalorder %s36_s10, %s3205_s20  ;;  %p3211_p5 = scmp.lt.s32.totalorder %s3205_s20, %s3205_s20 }
   0xe   :  { %p3212_p6 = por %p3211_p5, %p3210_p4 }
  0x10   :  { %p3213_p7 = pnand %p3212_p6, %p3206_p3 }
  0x12   :  { %3216 = shalt.err (!%p3213_p7)
}
  0x13   :  { %s3337_s21 = smov 128   ;;  %s3338_s22 = smov 8  }
  0x14   :  { %41 = dma.hbm_to_vmem [thread:$0]  %s3799_s1, 4096, %s36_s10, [#allocation8], %s3337_s21, %s3337_s21, %s3338_s22  }
  0x15   :  { %s3217_s27 = scalar_lea.hbm %s3803_s5, 12288 }
  0x16   :  { %p3218_p8 = scmp.ne.s32.totalorder %s3803_s5, %s3217_s27  ;;  %p3221_p9 = scmp.lt.u32.totalorder %s3217_s27, %s3803_s5 }
  0x18   :  { %p3223_p10 = pnand %p3221_p9, %p3218_p8 }
  0x1a   :  { %3226 = shalt.err (!%p3223_p10)
}
  0x1b   :  { %s3227_s13 = scalar_lea.vmem %s3395_s12, 12288  ;;  %p3232_p12 = scmp.lt.s32.totalorder %s3395_s12, %s3395_s12 }
  0x1c   :  { %p3228_p11 = scmp.ne.s32.totalorder %s3395_s12, %s3227_s13  ;;  %p3233_p13 = scmp.lt.s32.totalorder %s3227_s13, %s3227_s13 }
  0x1e   :  { %p3234_p0 = por %p3233_p13, %p3232_p12 }
  0x20   :  { %p3235_p1 = pnand %p3234_p0, %p3228_p11 }
  0x22   :  { %3238 = shalt.err (!%p3235_p1)
}
  0x23   :  { %69 = dma.hbm_to_vmem [thread:$0]  %s3803_s5, 12288, %s3395_s12, [#allocation11], %s3337_s21, %s3337_s21, %s3338_s22  }
  0x24   :  { %s3339_s14 = smov [#allocation4]   ;;  %s3340_s16 = smov [#allocation9]  }
  0x25   :  { %s23_s15 = sshll.u32 %s3339_s14, 4  ;;  %s49_s17 = sshll.u32 %s3340_s16, 4  ;;  %s24_s15 = int_to_ptr.vmem [resolvable:$true] %s23_s15  ;;  %s3432_s17 = int_to_ptr.vmem [resolvable:$true] %s49_s17 }
  0x26   :  { %s3239_s20 = scalar_lea.hbm %s3798_s0, 256 }
  0x27   :  { %p3240_p2 = scmp.ne.s32.totalorder %s3798_s0, %s3239_s20  ;;  %p3243_p3 = scmp.lt.u32.totalorder %s3239_s20, %s3798_s0 }
  0x29   :  { %p3245_p4 = pnand %p3243_p3, %p3240_p2 }
  0x2b   :  { %3248 = shalt.err (!%p3245_p4)
}
  0x2c   :  { %s3249_s5 = scalar_lea.vmem %s24_s15, 256  ;;  %p3254_p6 = scmp.lt.s32.totalorder %s24_s15, %s24_s15 }
  0x2d   :  { %p3250_p5 = scmp.ne.s32.totalorder %s24_s15, %s3249_s5  ;;  %p3255_p7 = scmp.lt.s32.totalorder %s3249_s5, %s3249_s5 }
  0x2f   :  { %p3256_p8 = por %p3255_p7, %p3254_p6 }
  0x31   :  { %p3257_p9 = pnand %p3256_p8, %p3250_p5 }
  0x33   :  { %3260 = shalt.err (!%p3257_p9)
}
  0x34   :  { %29 = dma.hbm_to_vmem [thread:$0]  %s3798_s0, 256, %s24_s15, [#allocation5], %s3337_s21, %s3337_s21, %s3338_s22  }
  0x35   :  { %s3261_s30 = scalar_lea.hbm %s3801_s3, 4096 }
  0x36   :  { %p3262_p10 = scmp.ne.s32.totalorder %s3801_s3, %s3261_s30  ;;  %p3265_p11 = scmp.lt.u32.totalorder %s3261_s30, %s3801_s3 }
  0x38   :  { %p3267_p12 = pnand %p3265_p11, %p3262_p10 }
  0x3a   :  { %3270 = shalt.err (!%p3267_p12)
}
  0x3b   :  { %s3271_s14 = scalar_lea.vmem %s3432_s17, 4096  ;;  %p3276_p0 = scmp.lt.s32.totalorder %s3432_s17, %s3432_s17 }
  0x3c   :  { %p3272_p13 = scmp.ne.s32.totalorder %s3432_s17, %s3271_s14  ;;  %p3277_p1 = scmp.lt.s32.totalorder %s3271_s14, %s3271_s14 }
  0x3e   :  { %p3278_p2 = por %p3277_p1, %p3276_p0 }
  0x40   :  { %p3279_p3 = pnand %p3278_p2, %p3272_p13 }
  0x42   :  { %3282 = shalt.err (!%p3279_p3)
}
  0x43   :  { %55 = dma.hbm_to_vmem [thread:$0]  %s3801_s3, 4096, %s3432_s17, [#allocation8], %s3337_s21, %s3337_s21, %s3338_s22  }
  0x44   :  { %s3341_s16 = smov [#allocation12]   ;;  %s3283_s23 = scalar_lea.hbm %s3805_s7, 12288 }
  0x45   :  { %s77_s18 = sshll.u32 %s3341_s16, 4  ;;  %p3284_p4 = scmp.ne.s32.totalorder %s3805_s7, %s3283_s23  ;;  %s78_s18 = int_to_ptr.vmem [resolvable:$true] %s77_s18 }
  0x46   :  { %p3287_p5 = scmp.lt.u32.totalorder %s3283_s23, %s3805_s7 }
  0x48   :  { %p3289_p6 = pnand %p3287_p5, %p3284_p4 }
  0x4a   :  { %3292 = shalt.err (!%p3289_p6)
}
  0x4b   :  { %s3293_s12 = scalar_lea.vmem %s78_s18, 12288  ;;  %p3298_p8 = scmp.lt.s32.totalorder %s78_s18, %s78_s18 }
  0x4c   :  { %p3294_p7 = scmp.ne.s32.totalorder %s78_s18, %s3293_s12  ;;  %p3299_p9 = scmp.lt.s32.totalorder %s3293_s12, %s3293_s12 }
  0x4e   :  { %p3300_p10 = por %p3299_p9, %p3298_p8 }
  0x50   :  { %p3301_p11 = pnand %p3300_p10, %p3294_p7 }
  0x52   :  { %3304 = shalt.err (!%p3301_p11)
}
  0x53   :  { %83 = dma.hbm_to_vmem [thread:$0]  %s3805_s7, 12288, %s78_s18, [#allocation11], %s3337_s21, %s3337_s21, %s3338_s22  }
  0x54   :  { %3327 = dma.done.wait [#allocation5], 256  }
  0x55   :  { %3328 = vsyncadd [#allocation5], 4294967040 }
  0x56   :  { %3329 = dma.done.wait [#allocation8], 8192  }
  0x57   :  { %3330 = vsyncadd [#allocation8], 4294959104 }
  0x58   :  { %3331 = dma.done.wait [#allocation11], 24576  }
  0x59   :  { %3332 = vsyncadd [#allocation11], 4294942720  ;;  %v2797_v0 = vld [vmem:[#allocation7 + $0x4] ss:$8 sps:$4 sm:$0xff]   ;;  %v2799_v1 = vld [vmem:[#allocation7] ss:$8 sps:$4 sm:$0xff]  }
  0x5a   :  { %318 = vmatprep.subr.bf16.mxu0 %v2797_v0  ;;  %v2800_v2 = vld [vmem:[#allocation7 + $0x14] ss:$8 sps:$4 sm:$0xff]   ;;  %v2802_v3 = vld [vmem:[#allocation7 + $0x10] ss:$8 sps:$4 sm:$0xff]   ;;  %v2803_v4 = vld [vmem:[#allocation7 + $0x24] ss:$8 sps:$4 sm:$0xff]  }
  0x5b   :  { %319 = vmatpush1.bf16.msra.mxu0 %v2799_v1  ;;  %v2805_v5 = vld [vmem:[#allocation7 + $0x20] ss:$8 sps:$4 sm:$0xff]   ;;  %v2806_v6 = vld [vmem:[#allocation7 + $0x34] ss:$8 sps:$4 sm:$0xff]   ;;  %v2808_v7 = vld [vmem:[#allocation7 + $0x30] ss:$8 sps:$4 sm:$0xff]  }
  0x5c   :  { %320 = vmatprep.subr.bf16.mxu0 %v2800_v2  ;;  %v2809_v8 = vld [vmem:[#allocation7 + $0x44] ss:$8 sps:$4 sm:$0xff]   ;;  %v2811_v9 = vld [vmem:[#allocation7 + $0x40] ss:$8 sps:$4 sm:$0xff]   ;;  %v2812_v10 = vld [vmem:[#allocation7 + $0x54] ss:$8 sps:$4 sm:$0xff]  }
  0x5d   :  { %v2814_v11 = vld [vmem:[#allocation7 + $0x50] ss:$8 sps:$4 sm:$0xff]   ;;  %v2815_v12 = vld [vmem:[#allocation7 + $0x64] ss:$8 sps:$4 sm:$0xff]   ;;  %v2817_v16 = vld [vmem:[#allocation7 + $0x60] ss:$8 sps:$4 sm:$0xff]  }
  0x5e   :  { %v3484_v13 = vld [vmem:[#allocation4] sm:$0xff]  ;;  %v3486_v14 = vld [vmem:[#allocation4 + $0x8] sm:$0xff]  ;;  %v2821_v19 = vld [vmem:[#allocation7 + $0x84] ss:$8 sps:$4 sm:$0xff]   ;;  %vm3808_vm0 = vsmask.f32 256 }
  0x5f   :  { %321 = vmatpush1.bf16.msra.mxu0 %v2802_v3  ;;  %v2492_v15 = vcombine.high %v3484_v13, %v3486_v14  ;;  %v2818_v17 = vld [vmem:[#allocation7 + $0x74] ss:$8 sps:$4 sm:$0xff]   ;;  %v2820_v18 = vld [vmem:[#allocation7 + $0x70] ss:$8 sps:$4 sm:$0xff]   ;;  %v2823_v20 = vld [vmem:[#allocation7 + $0x80] ss:$8 sps:$4 sm:$0xff]  }
  0x60   :  { %322 = vmatprep.subr.bf16.mxu0 %v2803_v4  ;;  %v2824_v21 = vld [vmem:[#allocation7 + $0x94] ss:$8 sps:$4 sm:$0xff]   ;;  %vm622_vm1 = vcmask 1040384   ;;  %vm626_vm2 = vsmask.f32 4352  ;;  %vm625_vm4 = vcmask 1044484  }
  0x61   :  { %350 = vmatprep.mubr.bf16.mxu0 %v2492_v15  ;;  %vm3491_vm3 = vmand %vm622_vm1, %vm3808_vm0  ;;  %vm632_vm5 = vsmask.f32 7938  ;;  %v2826_v23 = vld [vmem:[#allocation7 + $0x90] ss:$8 sps:$4 sm:$0xff]   ;;  %vm634_vm6 = vsmask.f32 7954 }
  0x62   :  { %v2827_v24 = vld [vmem:[#allocation7 + $0xa4] ss:$8 sps:$4 sm:$0xff]   ;;  %vm627_vm7 = vmand %vm625_vm4, %vm626_vm2  ;;  %v2829_v27 = vld [vmem:[#allocation7 + $0xa0] ss:$8 sps:$4 sm:$0xff]   ;;  %v648_v30 = vshrl.u32 %v3484_v13, 16  ;;  %vm657_vm12 = vcmask 1043456  }
  0x63   :  { %323 = vmatpush1.bf16.msra.mxu0 %v2805_v5  ;;  %vm3496_vm8 = vmand %vm622_vm1, %vm632_vm5  ;;  %v2830_v28 = vld [vmem:[#allocation7 + $0xb4] ss:$8 sps:$4 sm:$0xff]   ;;  %vm659_vm13 = vcmask 1047556   ;;  %vm3811_vm14 = vsmask.f32 1280  ;;  %v3826_v37 = vmov 0 }
  0x64   :  { %324 = vmatprep.subr.bf16.mxu0 %v2806_v6  ;;  %vm3501_vm9 = vmand %vm625_vm4, %vm634_vm6  ;;  %v2832_v31 = vld [vmem:[#allocation7 + $0xb0] ss:$8 sps:$4 sm:$0xff]   ;;  %v629_v32 = vld [vmem:[#allocation2] sm:$0x11]  ;;  %vm668_vm1 = vcmask 1041409   ;;  %vm671_vm2 = vcmask 1045509  }
  0x65   :  { %vm3507_vm10 = vmor %vm627_vm7, %vm3491_vm3  ;;  %v637_v33 = vld [vmem:[#allocation2 + $0x8] sm:$0x11]  ;;  %v650_v38 = vrot.slane %v648_v30, 7  ;;  %v651_v39 = vshll.u32 %v3484_v13, 16  ;;  %v3828_v40 = vmov 0  ;;  %v694_v43 = vshrl.u32 %v3486_v14, 16 }
  0x66   :  { %vm3809_vm11 = vmor %vm3501_vm9, %vm3496_vm8  ;;  %v2833_v34 = vld [vmem:[#allocation7 + $0xc4] ss:$8 sps:$4 sm:$0xff]   ;;  %v630_v35 = vsel %vm3507_vm10, 0, %v629_v32  ;;  %vm3810_vm4 = vsmask.f32 5376  ;;  %v697_v44 = vshll.u32 %v3486_v14, 16 }
  0x67   :  { %325 = vmatpush1.bf16.msra.mxu0 %v2808_v7  ;;  %v638_v36 = vsel %vm3809_vm11, 0, %v637_v33  ;;  %vm3524_vm15 = vmand %vm657_vm12, %vm632_vm5  ;;  %631 = vst [vmem:[#allocation2] sm:$0x11] %v630_v35  ;;  %v2835_v41 = vld [vmem:[#allocation7 + $0xc0] ss:$8 sps:$4 sm:$0xff]   ;;  %v653_v49 = vor.u32 %v651_v39, %v650_v38  ;;  %v654_v50 = vrot.slane %v650_v38, 4 }
  0x68   :  { %326 = vmatprep.subr.bf16.mxu0 %v2809_v8  ;;  %v3827_v37 = vsel %vm3524_vm15, 4294967295, %v3826_v37  ;;  %639 = vst [vmem:[#allocation2 + $0x8] sm:$0x11] %v638_v36  ;;  %vm3531_vm3 = vmand %vm659_vm13, %vm634_vm6  ;;  %v675_v42 = vld [vmem:[#allocation2 + $0x8] sm:$0x22]  ;;  %v3834_v53 = vmov 0 }
  0x69   :  { %v3829_v40 = vsel %vm3531_vm3, 4294967295, %v3828_v40  ;;  %vm3543_vm7 = vmand %vm668_vm1, %vm3811_vm14  ;;  %vm678_vm6 = vsmask.f32 7942  ;;  %v2836_v46 = vld [vmem:[#allocation7 + $0xd4] ss:$8 sps:$4 sm:$0xff]   ;;  %v696_v55 = vrot.slane %v694_v43, 6 }
  0x6a   :  { %vm3549_vm12 = vmand %vm671_vm2, %vm3810_vm4  ;;  %vm3813_vm13 = vsmask.f32 7958  ;;  %v2838_v48 = vld [vmem:[#allocation7 + $0xd0] ss:$8 sps:$4 sm:$0xff]   ;;  %v2839_v51 = vld [vmem:[#allocation7 + $0xe4] ss:$8 sps:$4 sm:$0xff]  }
  0x6b   :  { %327 = vmatpush1.bf16.msra.mxu0 %v2811_v9  ;;  %vm3812_vm0 = vmor %vm3549_vm12, %vm3543_vm7  ;;  %v683_v54 = vld [vmem:[#allocation2 + $0x10] sm:$0x22]  ;;  %v699_v56 = vrot.slane %v697_v44, 7  ;;  %vm704_vm4 = vcmask 1043457   ;;  %vm706_vm5 = vcmask 1047557  }
  0x6c   :  { %328 = vmatprep.subr.bf16.mxu0 %v2812_v10  ;;  %v676_v52 = vsel %vm3812_vm0, 0, %v675_v42  ;;  %vm3564_vm11 = vmand %vm668_vm1, %vm678_vm6  ;;  %v2841_v2 = vld [vmem:[#allocation7 + $0xe0] ss:$8 sps:$4 sm:$0xff]   ;;  %v2842_v3 = vld [vmem:[#allocation7 + $0xf4] ss:$8 sps:$4 sm:$0xff]  }
  0x6d   :  { %v3835_v53 = vsel %vm3564_vm11, 4294967295, %v3834_v53  ;;  %677 = vst [vmem:[#allocation2 + $0x8] sm:$0x22] %v676_v52  ;;  %vm3570_vm14 = vmand %vm671_vm2, %vm3813_vm13  ;;  %vm712_vm13 = vcmask 1041408   ;;  %v700_v0 = vor.u32 %v699_v56, %v696_v55  ;;  %v2844_v8 = vld [vmem:[#allocation7 + $0xf0] ss:$8 sps:$4 sm:$0xff]  }
  0x6e   :  { %v662_v58 = vld [vmem:[#allocation2] sm:$0xff]  ;;  %vm3816_vm1 = vmor %vm3570_vm14, %vm3564_vm11  ;;  %vm3847_vm11 = vsmask.f32 5376  ;;  %v2856_v32 = vld [vmem:[#allocation10 + $0x130] ss:$8 sps:$4 sm:$0xff]  }
  0x6f   :  { %329 = vmatpush1.bf16.msra.mxu0 %v2814_v11  ;;  %v665_v59 = vld [vmem:[#allocation2 + $0x8] sm:$0x11]  ;;  %vm3838_vm0 = vmor %vm3531_vm3, %vm3524_vm15  ;;  %v684_v62 = vsel %vm3816_vm1, 0, %v683_v54  ;;  %vm714_vm3 = vcmask 1045508   ;;  %v701_v6 = vrot.slane %v700_v0, 4 }
  0x70   :  { %330 = vmatprep.subr.bf16.mxu0 %v2815_v12  ;;  %v3583_v60 = vsel %vm3838_vm0, %v653_v49, %v662_v58  ;;  %v666_v61 = vsel %vm3507_vm10, %v654_v50, %v665_v59  ;;  %vm3593_vm2 = vmand %vm704_vm4, %vm678_vm6  ;;  %685 = vst [vmem:[#allocation2 + $0x10] sm:$0x22] %v684_v62  ;;  %vm3841_vm0 = vsmask.f32 7958  ;;  %vm3844_vm6 = vsmask.f32 1280 }
  0x71   :  { %664 = vst [vmem:[#allocation2] sm:$0xff] %v3583_v60  ;;  %667 = vst [vmem:[#allocation2 + $0x8] sm:$0x11] %v666_v61  ;;  %v2849_v10 = vld [vmem:[#allocation10 + $0x104] ss:$8 sps:$4 sm:$0xff]   ;;  %v2491_v12 = vcombine.low %v3484_v13, %v3486_v14 }
  0x72   :  { %vm3599_vm15 = vmand %vm706_vm5, %vm3841_vm0  ;;  %v2859_v36 = vld [vmem:[#allocation10 + $0x140] ss:$8 sps:$4 sm:$0xff]   ;;  %v2864_v38 = vld [vmem:[#allocation10 + $0x154] ss:$8 sps:$4 sm:$0xff]  }
  0x73   :  { %331 = vmatpush1.bf16.msra.mxu0 %v2817_v16  ;;  %vm708_vm4 = vmor %vm3599_vm15, %vm3593_vm2  ;;  %v2847_v16 = vld [vmem:[#allocation10 + $0x100] ss:$8 sps:$4 sm:$0xff]   ;;  %v2862_v39 = vld [vmem:[#allocation10 + $0x150] ss:$8 sps:$4 sm:$0xff]  }
  0x74   :  { %332 = vmatprep.subr.bf16.mxu0 %v2818_v17  ;;  %vm3608_vm1 = vmand %vm712_vm13, %vm3844_vm6  ;;  %v709_v7 = vld [vmem:[#allocation2 + $0x8] sm:$0xee]  ;;  %v2852_v17 = vld [vmem:[#allocation10 + $0x114] ss:$8 sps:$4 sm:$0xff]  }
  0x75   :  { %vm3613_vm5 = vmand %vm714_vm3, %vm3847_vm11  ;;  %v710_v9 = vsel %vm708_vm4, %v700_v0, %v709_v7  ;;  %vm802_vm11 = vsmask.f32 7424  ;;  %v2865_v42 = vld [vmem:[#allocation10 + $0x160] ss:$8 sps:$4 sm:$0xff]   ;;  %v2870_v43 = vld [vmem:[#allocation10 + $0x174] ss:$8 sps:$4 sm:$0xff]  }
  0x76   :  { %vm716_vm13 = vmor %vm3613_vm5, %vm3608_vm1  ;;  %711 = vst [vmem:[#allocation2 + $0x8] sm:$0xee] %v710_v9  ;;  %v2868_v44 = vld [vmem:[#allocation10 + $0x170] ss:$8 sps:$4 sm:$0xff]   ;;  %v2871_v49 = vld [vmem:[#allocation10 + $0x180] ss:$8 sps:$4 sm:$0xff]  }
  0x77   :  { %333 = vmatpush1.bf16.msra.mxu0 %v2820_v18  ;;  %v717_v11 = vld [vmem:[#allocation2 + $0x10] sm:$0x33]  ;;  %v2879_v55 = vld [vmem:[#allocation10 + $0x1a4] ss:$8 sps:$4 sm:$0xff]   ;;  %v2877_v59 = vld [vmem:[#allocation10 + $0x1a0] ss:$8 sps:$4 sm:$0xff]  }
  0x78   :  { %334 = vmatprep.subr.bf16.mxu0 %v2821_v19  ;;  %v718_v15 = vsel %vm716_vm13, %v701_v6, %v717_v11  ;;  %v2850_v18 = vld [vmem:[#allocation10 + $0x110] ss:$8 sps:$4 sm:$0xff]   ;;  %v2876_v50 = vld [vmem:[#allocation10 + $0x194] ss:$8 sps:$4 sm:$0xff]   ;;  %v2983_v58 = vld [vmem:[#allocation9 + $0x24] ss:$8 sps:$4 sm:$0xff]  }
  0x79   :  { %719 = vst [vmem:[#allocation2 + $0x10] sm:$0x33] %v718_v15  ;;  %v2977_v52 = vld [vmem:[#allocation9 + $0x14] ss:$8 sps:$4 sm:$0xff]   ;;  %v2874_v54 = vld [vmem:[#allocation10 + $0x190] ss:$8 sps:$4 sm:$0xff]   ;;  %vm3850_vm0 = vmor %vm3501_vm9, %vm3496_vm8  ;;  %vm3852_vm8 = vnez %v3835_v53 }
  0x7a   :  { %v2979_v56 = vld [vmem:[#allocation9 + $0x10] ss:$8 sps:$4 sm:$0xff]   ;;  %v2882_v61 = vld [vmem:[#allocation10 + $0x1b4] ss:$8 sps:$4 sm:$0xff]   ;;  %v2985_v62 = vld [vmem:[#allocation9 + $0x20] ss:$8 sps:$4 sm:$0xff]  }
  0x7b   :  { %335 = vmatpush1.bf16.msra.mxu0 %v2823_v20  ;;  %v2855_v20 = vld [vmem:[#allocation10 + $0x124] ss:$8 sps:$4 sm:$0xff]   ;;  %v2989_v0 = vld [vmem:[#allocation9 + $0x34] ss:$8 sps:$4 sm:$0xff]   ;;  %v2991_v6 = vld [vmem:[#allocation9 + $0x30] ss:$8 sps:$4 sm:$0xff]  }
  0x7c   :  { %336 = vmatprep.subr.bf16.mxu0 %v2824_v21  ;;  %v2883_v9 = vld [vmem:[#allocation10 + $0x1c0] ss:$8 sps:$4 sm:$0xff]   ;;  %vm1307_vm3 = vcmask 1046528   ;;  %vm3851_vm6 = vmor %vm3549_vm12, %vm3543_vm7  ;;  %v3077_v47 = vld [vmem:[#allocation12 + $0x1a4] ss:$8 sps:$4 sm:$0xff]   ;;  %vm3855_vm7 = vnez %v3827_v37 }
  0x7d   :  { %v3633_v19 = vld [vmem:[#allocation2 + $0x8] sm:$0xff]  ;;  %vm3853_vm9 = vmor %vm3570_vm14, %vm3852_vm8  ;;  %vm3854_vm14 = vnez %v3829_v40 }
  0x7e   :  { %v3637_v13 = vcombine.high %v3583_v60, %v3633_v19  ;;  %v3654_v7 = vcombine.low %v3583_v60, %v3633_v19  ;;  %v2997_v11 = vld [vmem:[#allocation9 + $0x40] ss:$8 sps:$4 sm:$0xff]   ;;  %v3003_v60 = vld [vmem:[#allocation9 + $0x50] ss:$8 sps:$4 sm:$0xff]   ;;  %v3089_v53 = vld [vmem:[#allocation12 + $0x1e4] ss:$8 sps:$4 sm:$0xff]  }
  0x7f   :  { %337 = vmatpush1.bf16.msra.mxu0 %v2826_v23  ;;  %v2853_v23 = vld [vmem:[#allocation10 + $0x120] ss:$8 sps:$4 sm:$0xff]   ;;  %vm3856_vm12 = vmor %vm3854_vm14, %vm3855_vm7 }
  0x80   :  { %338 = vmatprep.subr.bf16.mxu0 %v2827_v24  ;;  %v3639_v14 = vld [vmem:[#allocation2 + $0x10] sm:$0x33]  ;;  %v816_v21 = vshrl.u32 %v3637_v13, 16  ;;  %v818_v22 = vshll.u32 %v3637_v13, 16  ;;  %v806_v15 = vshll.u32 %v3654_v7, 16 }
  0x81   :  { %v3645_v24 = vcombine.high %v3639_v14, %v3639_v14  ;;  %v3087_v57 = vld [vmem:[#allocation12 + $0x1e0] ss:$8 sps:$4 sm:$0xff]  }
  0x83   :  { %339 = vmatpush1.bf16.msra.mxu0 %v2829_v27  ;;  %v2858_v27 = vld [vmem:[#allocation10 + $0x134] ss:$8 sps:$4 sm:$0xff]   ;;  %v823_v30 = vshll.u32 %v3645_v24, 16 }
  0x84   :  { %340 = vmatprep.subr.bf16.mxu0 %v2830_v28  ;;  %v820_v28 = vrot.slane %v818_v22, 1 }
  0x85   :  { %v3648_v33 = vrot.slane %v823_v30, 1 }
  0x87   :  { %341 = vmatpush1.bf16.msra.mxu0 %v2832_v31  ;;  %v821_v31 = vor.u32 %v820_v28, %v816_v21  ;;  %v808_v21 = vrot.slane %v806_v15, 1  ;;  %v3009_v28 = vld [vmem:[#allocation9 + $0x60] ss:$8 sps:$4 sm:$0xff]   ;;  %v2906_v15 = vld [vmem:[#allocation10 + $0x30] ss:$8 sps:$4 sm:$0xff]  }
  0x88   :  { %342 = vmatprep.subr.bf16.mxu0 %v2833_v34  ;;  %v2861_v34 = vld [vmem:[#allocation10 + $0x144] ss:$8 sps:$4 sm:$0xff]  }
  0x89   :  { %v826_v35 = vsel %vm802_vm11, %v821_v31, %v3648_v33 }
  0x8b   :  { %343 = vmatpush1.bf16.msra.mxu0 %v2835_v41  ;;  %v2867_v41 = vld [vmem:[#allocation10 + $0x164] ss:$8 sps:$4 sm:$0xff]  }
  0x8c   :  { %344 = vmatprep.subr.bf16.mxu0 %v2836_v46  ;;  %v2873_v46 = vld [vmem:[#allocation10 + $0x184] ss:$8 sps:$4 sm:$0xff]  }
  0x8f   :  { %345 = vmatpush1.bf16.msra.mxu0 %v2838_v48  ;;  %v2971_v48 = vld [vmem:[#allocation9 + $0x4] ss:$8 sps:$4 sm:$0xff]  }
  0x90   :  { %346 = vmatprep.subr.bf16.mxu0 %v2839_v51  ;;  %v2973_v51 = vld [vmem:[#allocation9] ss:$8 sps:$4 sm:$0xff]   ;;  %571 = vmatprep.subr.bf16.mxu1 %v2971_v48 }
  0x91   :  { %572 = vmatpush1.bf16.msra.mxu1 %v2973_v51  ;;  %v3021_v51 = vld [vmem:[#allocation9 + $0x80] ss:$8 sps:$4 sm:$0xff]  }
  0x92   :  { %573 = vmatprep.subr.bf16.mxu1 %v2977_v52 }
  0x93   :  { %347 = vmatpush1.bf16.msra.mxu0 %v2841_v2  ;;  %v2880_v2 = vld [vmem:[#allocation10 + $0x1b0] ss:$8 sps:$4 sm:$0xff]  }
  0x94   :  { %348 = vmatprep.subr.bf16.mxu0 %v2842_v3  ;;  %v2885_v3 = vld [vmem:[#allocation10 + $0x1c4] ss:$8 sps:$4 sm:$0xff]  }
  0x95   :  { %574 = vmatpush1.bf16.msra.mxu1 %v2979_v56  ;;  %v2900_v56 = vld [vmem:[#allocation10 + $0x10] ss:$8 sps:$4 sm:$0xff]  }
  0x96   :  { %575 = vmatprep.subr.bf16.mxu1 %v2983_v58 }
  0x97   :  { %349 = vmatpush1.bf16.msra.mxu0 %v2844_v8  ;;  %v2995_v8 = vld [vmem:[#allocation9 + $0x44] ss:$8 sps:$4 sm:$0xff]  }
  0x98   :  { %997 = vmatprep.subr.bf16.mxu0 %v2849_v10  ;;  %v2888_v10 = vld [vmem:[#allocation10 + $0x1d4] ss:$8 sps:$4 sm:$0xff]  }
  0x99   :  { %576 = vmatpush1.bf16.msra.mxu1 %v2985_v62  ;;  %v3026_v62 = vld [vmem:[#allocation9 + $0x90] ss:$8 sps:$4 sm:$0xff]  }
  0x9a   :  { %351 = vmatmul.mubr.bf16.vlgmr.msra.gmra.mrb[0].mxu0 %v2491_v12  ;;  %577 = vmatprep.subr.bf16.mxu1 %v2989_v0  ;;  %v3658_v12 = vcombine.low %v3639_v14, %v3639_v14  ;;  %v2894_v14 = vld [vmem:[#allocation10 + $0x1f4] ss:$8 sps:$4 sm:$0xff]   ;;  %v3027_v0 = vld [vmem:[#allocation9 + $0xa4] ss:$8 sps:$4 sm:$0xff]  }
  0x9b   :  { %998 = vmatpush1.bf16.msra.mxu0 %v2847_v16  ;;  %1029 = vmatprep.mubr.bf16.mxu0 %v826_v35  ;;  %v3001_v16 = vld [vmem:[#allocation9 + $0x54] ss:$8 sps:$4 sm:$0xff]   ;;  %v2892_v35 = vld [vmem:[#allocation10 + $0x1f0] ss:$8 sps:$4 sm:$0xff]  }
  0x9c   :  { %999 = vmatprep.subr.bf16.mxu0 %v2852_v17  ;;  %v2886_v17 = vld [vmem:[#allocation10 + $0x1d0] ss:$8 sps:$4 sm:$0xff]   ;;  %v811_v22 = vshll.u32 %v3658_v12, 16 }
  0x9d   :  { %578 = vmatpush1.bf16.msra.mxu1 %v2991_v6  ;;  %v2908_v6 = vld [vmem:[#allocation10 + $0x34] ss:$8 sps:$4 sm:$0xff]  }
  0x9e   :  { %579 = vmatprep.subr.bf16.mxu1 %v2995_v8  ;;  %v813_v31 = vrot.slane %v811_v22, 1  ;;  %v2917_v22 = vld [vmem:[#allocation10 + $0x64] ss:$8 sps:$4 sm:$0xff]  }
  0x9f   :  { %1000 = vmatpush1.bf16.msra.mxu0 %v2850_v18  ;;  %v2891_v18 = vld [vmem:[#allocation10 + $0x1e4] ss:$8 sps:$4 sm:$0xff]  }
  0xa0   :  { %1001 = vmatprep.subr.bf16.mxu0 %v2855_v20  ;;  %v804_v20 = vshrl.u32 %v3654_v7, 16 }
  0xa1   :  { %580 = vmatpush1.bf16.msra.mxu1 %v2997_v11  ;;  %v3033_v11 = vld [vmem:[#allocation9 + $0xc4] ss:$8 sps:$4 sm:$0xff]  }
  0xa2   :  { %581 = vmatprep.subr.bf16.mxu1 %v3001_v16  ;;  %v809_v30 = vor.u32 %v808_v21, %v804_v20  ;;  %v2911_v16 = vld [vmem:[#allocation10 + $0x44] ss:$8 sps:$4 sm:$0xff]   ;;  %v2914_v20 = vld [vmem:[#allocation10 + $0x54] ss:$8 sps:$4 sm:$0xff]   ;;  %v2912_v21 = vld [vmem:[#allocation10 + $0x50] ss:$8 sps:$4 sm:$0xff]  }
  0xa3   :  { %1002 = vmatpush1.bf16.msra.mxu0 %v2853_v23  ;;  %v3007_v23 = vld [vmem:[#allocation9 + $0x64] ss:$8 sps:$4 sm:$0xff]  }
  0xa4   :  { %1003 = vmatprep.subr.bf16.mxu0 %v2858_v27  ;;  %v2889_v27 = vld [vmem:[#allocation10 + $0x1e0] ss:$8 sps:$4 sm:$0xff]  }
  0xa5   :  { %582 = vmatpush1.bf16.msra.mxu1 %v3003_v60  ;;  %v2909_v60 = vld [vmem:[#allocation10 + $0x40] ss:$8 sps:$4 sm:$0xff]  }
  0xa6   :  { %583 = vmatprep.subr.bf16.mxu1 %v3007_v23  ;;  %v3038_v23 = vld [vmem:[#allocation9 + $0xd0] ss:$8 sps:$4 sm:$0xff]  }
  0xa7   :  { %1004 = vmatpush1.bf16.msra.mxu0 %v2856_v32  ;;  %v830_v32 = vshrl.u32 %v3645_v24, 16 }
  0xa8   :  { %1005 = vmatprep.subr.bf16.mxu0 %v2861_v34  ;;  %v3013_v34 = vld [vmem:[#allocation9 + $0x74] ss:$8 sps:$4 sm:$0xff]  }
  0xa9   :  { %584 = vmatpush1.bf16.msra.mxu1 %v3009_v28  ;;  %v832_v48 = vor.u32 %v830_v32, %v3648_v33  ;;  %v2920_v28 = vld [vmem:[#allocation10 + $0x74] ss:$8 sps:$4 sm:$0xff]   ;;  %v3044_v32 = vld [vmem:[#allocation9 + $0xf0] ss:$8 sps:$4 sm:$0xff]  }
  0xaa   :  { %585 = vmatprep.subr.bf16.mxu1 %v3013_v34  ;;  %v2923_v34 = vld [vmem:[#allocation10 + $0x84] ss:$8 sps:$4 sm:$0xff]  }
  0xab   :  { %1006 = vmatpush1.bf16.msra.mxu0 %v2859_v36  ;;  %v2898_v36 = vld [vmem:[#allocation10 + $0x4] ss:$8 sps:$4 sm:$0xff]  }
  0xac   :  { %1007 = vmatprep.subr.bf16.mxu0 %v2864_v38  ;;  %v3015_v38 = vld [vmem:[#allocation9 + $0x70] ss:$8 sps:$4 sm:$0xff]  }
  0xad   :  { %586 = vmatpush1.bf16.msra.mxu1 %v3015_v38  ;;  %v2924_v38 = vld [vmem:[#allocation10 + $0x90] ss:$8 sps:$4 sm:$0xff]  }
  0xaf   :  { %1008 = vmatpush1.bf16.msra.mxu0 %v2862_v39  ;;  %v1268_v39 = vld [vmem:[#allocation2] sm:$0xee] }
  0xb0   :  { %1009 = vmatprep.subr.bf16.mxu0 %v2867_v41  ;;  %v2896_v41 = vld [vmem:[#allocation10] ss:$8 sps:$4 sm:$0xff]  }
  0xb3   :  { %1010 = vmatpush1.bf16.msra.mxu0 %v2865_v42  ;;  %v2627_v42 = vcombine.low %v1268_v39, %v3633_v19 }
  0xb4   :  { %1011 = vmatprep.subr.bf16.mxu0 %v2870_v43  ;;  %v2628_v43 = vcombine.high %v1268_v39, %v3633_v19  ;;  %v827_v19 = vshrl.u32 %v3658_v12, 16  ;;  %v2929_v39 = vld [vmem:[#allocation10 + $0xa4] ss:$8 sps:$4 sm:$0xff]  }
  0xb5   :  { %v1308_v52 = vrot.slane %v2627_v42, 1  ;;  %v2932_v42 = vld [vmem:[#allocation10 + $0xb4] ss:$8 sps:$4 sm:$0xff]  }
  0xb6   :  { %v829_v8 = vor.u32 %v827_v19, %v813_v31  ;;  %v2947_v19 = vld [vmem:[#allocation10 + $0x204] ss:$8 sps:$4 sm:$0xff]  }
  0xb7   :  { %1012 = vmatpush1.bf16.msra.mxu0 %v2868_v44  ;;  %v814_v44 = vsel %vm802_vm11, %v809_v30, %v813_v31  ;;  %v3042_v30 = vld [vmem:[#allocation9 + $0xf4] ss:$8 sps:$4 sm:$0xff]   ;;  %v2918_v31 = vld [vmem:[#allocation10 + $0x70] ss:$8 sps:$4 sm:$0xff]  }
  0xb8   :  { %1013 = vmatprep.subr.bf16.mxu0 %v2873_v46  ;;  %v2902_v46 = vld [vmem:[#allocation10 + $0x14] ss:$8 sps:$4 sm:$0xff]  }
  0xbb   :  { %1014 = vmatpush1.bf16.msra.mxu0 %v2871_v49  ;;  %v3019_v49 = vld [vmem:[#allocation9 + $0x84] ss:$8 sps:$4 sm:$0xff]  }
  0xbc   :  { %1015 = vmatprep.subr.bf16.mxu0 %v2876_v50  ;;  %v1312_v50 = vrot.slane %v3645_v24, 1  ;;  %587 = vmatprep.subr.bf16.mxu1 %v3019_v49  ;;  %v2936_v49 = vld [vmem:[#allocation10 + $0xd0] ss:$8 sps:$4 sm:$0xff]  }
  0xbd   :  { %588 = vmatpush1.bf16.msra.mxu1 %v3021_v51  ;;  %v2941_v51 = vld [vmem:[#allocation10 + $0xe4] ss:$8 sps:$4 sm:$0xff]  }
  0xbf   :  { %1016 = vmatpush1.bf16.msra.mxu0 %v2874_v54  ;;  %v1311_v54 = vrot.slane %v2628_v43, 1  ;;  %v2930_v43 = vld [vmem:[#allocation10 + $0xb0] ss:$8 sps:$4 sm:$0xff]  }
  0xc0   :  { %1017 = vmatprep.subr.bf16.mxu0 %v2879_v55  ;;  %v1309_v55 = vrot.slane %v3658_v12, 1 }
  0xc1   :  { %v3674_v33 = vsel %vm1307_vm3, %v1311_v54, %v1312_v50  ;;  %v2944_v54 = vld [vmem:[#allocation10 + $0xf4] ss:$8 sps:$4 sm:$0xff]  }
  0xc2   :  { %v3679_v58 = vsel %vm1307_vm3, %v1308_v52, %v1309_v55  ;;  %v2939_v52 = vld [vmem:[#allocation10 + $0xe0] ss:$8 sps:$4 sm:$0xff]  }
  0xc3   :  { %1018 = vmatpush1.bf16.msra.mxu0 %v2877_v59  ;;  %v2905_v59 = vld [vmem:[#allocation10 + $0x24] ss:$8 sps:$4 sm:$0xff]  }
  0xc4   :  { %1019 = vmatprep.subr.bf16.mxu0 %v2882_v61  ;;  %v3024_v61 = vld [vmem:[#allocation9 + $0x94] ss:$8 sps:$4 sm:$0xff]  }
  0xc5   :  { %589 = vmatprep.subr.bf16.mxu1 %v3024_v61  ;;  %v2945_v61 = vld [vmem:[#allocation10 + $0x200] ss:$8 sps:$4 sm:$0xff]  }
  0xc6   :  { %590 = vmatpush1.bf16.msra.mxu1 %v3026_v62 }
  0xc7   :  { %1020 = vmatpush1.bf16.msra.mxu0 %v2880_v2  ;;  %v3029_v2 = vld [vmem:[#allocation9 + $0xa0] ss:$8 sps:$4 sm:$0xff]   ;;  %591 = vmatprep.subr.bf16.mxu1 %v3027_v0  ;;  %v2950_v0 = vld [vmem:[#allocation10 + $0x214] ss:$8 sps:$4 sm:$0xff]  }
  0xc8   :  { %1021 = vmatprep.subr.bf16.mxu0 %v2885_v3  ;;  %v2903_v3 = vld [vmem:[#allocation10 + $0x20] ss:$8 sps:$4 sm:$0xff]  }
  0xca   :  { %592 = vmatpush1.bf16.msra.mxu1 %v3029_v2  ;;  %v2948_v2 = vld [vmem:[#allocation10 + $0x210] ss:$8 sps:$4 sm:$0xff]  }
  0xcb   :  { %1022 = vmatpush1.bf16.msra.mxu0 %v2883_v9  ;;  %v3030_v9 = vld [vmem:[#allocation9 + $0xb4] ss:$8 sps:$4 sm:$0xff]  }
  0xcc   :  { %1023 = vmatprep.subr.bf16.mxu0 %v2888_v10  ;;  %v3032_v10 = vld [vmem:[#allocation9 + $0xb0] ss:$8 sps:$4 sm:$0xff]   ;;  %593 = vmatprep.subr.bf16.mxu1 %v3030_v9  ;;  %v2958_v9 = vld [vmem:[#allocation10 + $0x234] ss:$8 sps:$4 sm:$0xff]  }
  0xce   :  { %594 = vmatpush1.bf16.msra.mxu1 %v3032_v10  ;;  %v2956_v10 = vld [vmem:[#allocation10 + $0x230] ss:$8 sps:$4 sm:$0xff]  }
  0xcf   :  { %1024 = vmatpush1.bf16.msra.mxu0 %v2886_v17  ;;  %v3035_v17 = vld [vmem:[#allocation9 + $0xc0] ss:$8 sps:$4 sm:$0xff]   ;;  %595 = vmatprep.subr.bf16.mxu1 %v3033_v11  ;;  %v2961_v11 = vld [vmem:[#allocation10 + $0x244] ss:$8 sps:$4 sm:$0xff]  }
  0xd0   :  { %1025 = vmatprep.subr.bf16.mxu0 %v2891_v18  ;;  %v3036_v18 = vld [vmem:[#allocation9 + $0xd4] ss:$8 sps:$4 sm:$0xff]  }
  0xd2   :  { %596 = vmatpush1.bf16.msra.mxu1 %v3035_v17  ;;  %v2967_v17 = vld [vmem:[#allocation10 + $0x264] ss:$8 sps:$4 sm:$0xff]  }
  0xd3   :  { %1026 = vmatpush1.bf16.msra.mxu0 %v2889_v27  ;;  %597 = vmatprep.subr.bf16.mxu1 %v3036_v18  ;;  %v3039_v27 = vld [vmem:[#allocation9 + $0xe4] ss:$8 sps:$4 sm:$0xff]   ;;  %v2965_v18 = vld [vmem:[#allocation10 + $0x260] ss:$8 sps:$4 sm:$0xff]  }
  0xd4   :  { %1027 = vmatprep.subr.bf16.mxu0 %v2894_v14  ;;  %v3041_v14 = vld [vmem:[#allocation9 + $0xe0] ss:$8 sps:$4 sm:$0xff]  }
  0xd6   :  { %598 = vmatpush1.bf16.msra.mxu1 %v3038_v23  ;;  %v2980_v23 = vld [vmem:[#allocation10 + $0x290] ss:$8 sps:$4 sm:$0xff]  }
  0xd7   :  { %1028 = vmatpush1.bf16.msra.mxu0 %v2892_v35  ;;  %599 = vmatprep.subr.bf16.mxu1 %v3039_v27  ;;  %v2921_v35 = vld [vmem:[#allocation10 + $0x80] ss:$8 sps:$4 sm:$0xff]   ;;  %v2988_v27 = vld [vmem:[#allocation10 + $0x2a4] ss:$8 sps:$4 sm:$0xff]  }
  0xd8   :  { %1217 = vmatprep.subr.bf16.mxu0 %v2898_v36  ;;  %v2926_v36 = vld [vmem:[#allocation10 + $0x94] ss:$8 sps:$4 sm:$0xff]  }
  0xda   :  { %1030 = vmatmul.mubr.bf16.vlgmr.msra.gmra.mrb[4].mxu0 %v814_v44  ;;  %600 = vmatpush1.bf16.msra.mxu1 %v3041_v14  ;;  %v2935_v44 = vld [vmem:[#allocation10 + $0xc4] ss:$8 sps:$4 sm:$0xff]   ;;  %v2994_v14 = vld [vmem:[#allocation10 + $0x2b4] ss:$8 sps:$4 sm:$0xff]  }
  0xdb   :  { %1218 = vmatpush1.bf16.msra.mxu0 %v2896_v41  ;;  %1039 = vmatprep.mubr.bf16.mxu0 %v832_v48  ;;  %v2927_v41 = vld [vmem:[#allocation10 + $0xa0] ss:$8 sps:$4 sm:$0xff]   ;;  %v2938_v48 = vld [vmem:[#allocation10 + $0xd4] ss:$8 sps:$4 sm:$0xff]  }
  0xdc   :  { %1219 = vmatprep.subr.bf16.mxu0 %v2902_v46  ;;  %601 = vmatprep.subr.bf16.mxu1 %v3042_v30  ;;  %v2933_v46 = vld [vmem:[#allocation10 + $0xc0] ss:$8 sps:$4 sm:$0xff]   ;;  %v3000_v30 = vld [vmem:[#allocation10 + $0x2c4] ss:$8 sps:$4 sm:$0xff]  }
  0xde   :  { %602 = vmatpush1.bf16.msra.mxu1 %v3044_v32  ;;  %v3006_v32 = vld [vmem:[#allocation10 + $0x2d4] ss:$8 sps:$4 sm:$0xff]  }
  0xdf   :  { %1220 = vmatpush1.bf16.msra.mxu0 %v2900_v56  ;;  %v2942_v56 = vld [vmem:[#allocation10 + $0xf0] ss:$8 sps:$4 sm:$0xff]  }
  0xe0   :  { %1221 = vmatprep.subr.bf16.mxu0 %v2905_v59  ;;  %v722_v59 = vld [vmem:[#allocation2 + $0x10] sm:$0x11] }
  0xe1   :  { %v2594_v62 = vcombine.high %v722_v59, %v722_v59 }
  0xe2   :  { %1040 = vmatmul.mubr.bf16.gmra.mrb[8].mxu0 %v829_v8  ;;  %v2953_v8 = vld [vmem:[#allocation10 + $0x220] ss:$8 sps:$4 sm:$0xff]  }
  0xe3   :  { %1222 = vmatpush1.bf16.msra.mxu0 %v2903_v3  ;;  %1249 = vmatprep.mubr.bf16.mxu0 %v3637_v13  ;;  %v2915_v13 = vld [vmem:[#allocation10 + $0x60] ss:$8 sps:$4 sm:$0xff]   ;;  %v2955_v3 = vld [vmem:[#allocation10 + $0x224] ss:$8 sps:$4 sm:$0xff]  }
  0xe4   :  { %1223 = vmatprep.subr.bf16.mxu0 %v2908_v6  ;;  %v2593_v6 = vcombine.low %v722_v59, %v722_v59 }
  0xe7   :  { %1224 = vmatpush1.bf16.msra.mxu0 %v2906_v15  ;;  %v2959_v15 = vld [vmem:[#allocation10 + $0x240] ss:$8 sps:$4 sm:$0xff]  }
  0xe8   :  { %1225 = vmatprep.subr.bf16.mxu0 %v2911_v16  ;;  %v2962_v16 = vld [vmem:[#allocation10 + $0x250] ss:$8 sps:$4 sm:$0xff]  }
  0xeb   :  { %1226 = vmatpush1.bf16.msra.mxu0 %v2909_v60  ;;  %v2970_v60 = vld [vmem:[#allocation10 + $0x274] ss:$8 sps:$4 sm:$0xff]  }
  0xec   :  { %1227 = vmatprep.subr.bf16.mxu0 %v2914_v20  ;;  %v2968_v20 = vld [vmem:[#allocation10 + $0x270] ss:$8 sps:$4 sm:$0xff]  }
  0xef   :  { %1228 = vmatpush1.bf16.msra.mxu0 %v2912_v21  ;;  %v2976_v21 = vld [vmem:[#allocation10 + $0x284] ss:$8 sps:$4 sm:$0xff]  }
  0xf0   :  { %1229 = vmatprep.subr.bf16.mxu0 %v2917_v22  ;;  %v2982_v22 = vld [vmem:[#allocation10 + $0x294] ss:$8 sps:$4 sm:$0xff]  }
  0xf3   :  { %1230 = vmatpush1.bf16.msra.mxu0 %v2915_v13  ;;  %v2986_v13 = vld [vmem:[#allocation10 + $0x2a0] ss:$8 sps:$4 sm:$0xff]  }
  0xf4   :  { %1231 = vmatprep.subr.bf16.mxu0 %v2920_v28  ;;  %v2992_v28 = vld [vmem:[#allocation10 + $0x2b0] ss:$8 sps:$4 sm:$0xff]  }
  0xf7   :  { %1232 = vmatpush1.bf16.msra.mxu0 %v2918_v31  ;;  %v2998_v31 = vld [vmem:[#allocation10 + $0x2c0] ss:$8 sps:$4 sm:$0xff]  }
  0xf8   :  { %1233 = vmatprep.subr.bf16.mxu0 %v2923_v34  ;;  %v3004_v34 = vld [vmem:[#allocation10 + $0x2d0] ss:$8 sps:$4 sm:$0xff]  }
  0xfb   :  { %1234 = vmatpush1.bf16.msra.mxu0 %v2921_v35  ;;  %v3012_v35 = vld [vmem:[#allocation10 + $0x2e4] ss:$8 sps:$4 sm:$0xff]  }
  0xfc   :  { %1235 = vmatprep.subr.bf16.mxu0 %v2926_v36  ;;  %v3010_v36 = vld [vmem:[#allocation10 + $0x2e0] ss:$8 sps:$4 sm:$0xff]  }
  0xff   :  { %1236 = vmatpush1.bf16.msra.mxu0 %v2924_v38  ;;  %v3018_v38 = vld [vmem:[#allocation10 + $0x2f4] ss:$8 sps:$4 sm:$0xff]  }
 0x100   :  { %1237 = vmatprep.subr.bf16.mxu0 %v2929_v39  ;;  %v3016_v39 = vld [vmem:[#allocation10 + $0x2f0] ss:$8 sps:$4 sm:$0xff]  }
 0x103   :  { %1238 = vmatpush1.bf16.msra.mxu0 %v2927_v41  ;;  %v138_v41 = vlaneseq }
 0x104   :  { %1239 = vmatprep.subr.bf16.mxu0 %v2932_v42 }
 0x105   :  { %v139_v42 = vshrl.u32 %v138_v41, 7  ;;  %v3080_v41 = vld [vmem:[#allocation12 + $0x1b4] ss:$8 sps:$4 sm:$0xff]  }
 0x107   :  { %1240 = vmatpush1.bf16.msra.mxu0 %v2930_v43  ;;  %v3689_v43 = vsub.s32 0, %v139_v42 }
 0x108   :  { %1241 = vmatprep.subr.bf16.mxu0 %v2935_v44  ;;  %v136_v44 = vld [vmem:[%s3800_s2] sm:$0x3] }
 0x10b   :  { %1242 = vmatpush1.bf16.msra.mxu0 %v2933_v46  ;;  %v3694_v46 = vsub.s32 1, %v139_v42  ;;  %v3078_v42 = vld [vmem:[#allocation12 + $0x1b0] ss:$8 sps:$4 sm:$0xff]  }
 0x10c   :  { %1243 = vmatprep.subr.bf16.mxu0 %v2938_v48  ;;  %v141_v48 = vrot.slane %v136_v44, %v3689_v43 }
 0x10f   :  { %1244 = vmatpush1.bf16.msra.mxu0 %v2936_v49 }
 0x110   :  { %1245 = vmatprep.subr.bf16.mxu0 %v2941_v51 }
 0x113   :  { %1246 = vmatpush1.bf16.msra.mxu0 %v2939_v52 }
 0x114   :  { %1247 = vmatprep.subr.bf16.mxu0 %v2944_v54 }
 0x117   :  { %1248 = vmatpush1.bf16.msra.mxu0 %v2942_v56 }
 0x118   :  { %1478 = vmatprep.subr.bf16.mxu0 %v2947_v19 }
 0x11a   :  { %1250 = vmatmul.mubr.bf16.vlgmr.msra.gmra.mrb[4].mxu0 %v3654_v7  ;;  %v2964_v7 = vld [vmem:[#allocation10 + $0x254] ss:$8 sps:$4 sm:$0xff]  }
 0x11b   :  { %1479 = vmatpush1.bf16.msra.mxu0 %v2945_v61  ;;  %1259 = vmatprep.mubr.bf16.mxu0 %v2594_v62 }
 0x11c   :  { %1480 = vmatprep.subr.bf16.mxu0 %v2950_v0 }
 0x11f   :  { %1481 = vmatpush1.bf16.msra.mxu0 %v2948_v2  ;;  %v3045_v2 = vld [vmem:[#allocation12 + $0x100] ss:$8 sps:$4 sm:$0xff]  }
 0x120   :  { %1482 = vmatprep.subr.bf16.mxu0 %v2955_v3  ;;  %v3047_v3 = vld [vmem:[#allocation12 + $0x104] ss:$8 sps:$4 sm:$0xff]  }
 0x121   :  { %1894 = vmatprep.subr.bf16.mxu1 %v3047_v3 }
 0x122   :  { %1260 = vmatmul.mubr.bf16.gmra.mrb[12].mxu0 %v2593_v6  ;;  %v3050_v6 = vld [vmem:[#allocation12 + $0x114] ss:$8 sps:$4 sm:$0xff]  }
 0x123   :  { %1483 = vmatpush1.bf16.msra.mxu0 %v2953_v8  ;;  %1510 = vmatprep.mubr.bf16.mxu0 %v3674_v33  ;;  %v2974_v33 = vld [vmem:[#allocation10 + $0x280] ss:$8 sps:$4 sm:$0xff]   ;;  %v3048_v8 = vld [vmem:[#allocation12 + $0x110] ss:$8 sps:$4 sm:$0xff]  }
 0x124   :  { %1484 = vmatprep.subr.bf16.mxu0 %v2958_v9  ;;  %v3053_v9 = vld [vmem:[#allocation12 + $0x124] ss:$8 sps:$4 sm:$0xff]  }
 0x127   :  { %1485 = vmatpush1.bf16.msra.mxu0 %v2956_v10  ;;  %v3051_v10 = vld [vmem:[#allocation12 + $0x120] ss:$8 sps:$4 sm:$0xff]  }
 0x128   :  { %1486 = vmatprep.subr.bf16.mxu0 %v2961_v11  ;;  %v3056_v11 = vld [vmem:[#allocation12 + $0x134] ss:$8 sps:$4 sm:$0xff]  }
 0x12b   :  { %1487 = vmatpush1.bf16.msra.mxu0 %v2959_v15  ;;  %v3054_v15 = vld [vmem:[#allocation12 + $0x130] ss:$8 sps:$4 sm:$0xff]  }
 0x12c   :  { %1488 = vmatprep.subr.bf16.mxu0 %v2964_v7  ;;  %v3059_v7 = vld [vmem:[#allocation12 + $0x144] ss:$8 sps:$4 sm:$0xff]  }
 0x12f   :  { %1489 = vmatpush1.bf16.msra.mxu0 %v2962_v16  ;;  %v3057_v16 = vld [vmem:[#allocation12 + $0x140] ss:$8 sps:$4 sm:$0xff]  }
 0x130   :  { %1490 = vmatprep.subr.bf16.mxu0 %v2967_v17  ;;  %v3062_v17 = vld [vmem:[#allocation12 + $0x154] ss:$8 sps:$4 sm:$0xff]  }
 0x133   :  { %1491 = vmatpush1.bf16.msra.mxu0 %v2965_v18  ;;  %v3060_v18 = vld [vmem:[#allocation12 + $0x150] ss:$8 sps:$4 sm:$0xff]  }
 0x134   :  { %1492 = vmatprep.subr.bf16.mxu0 %v2970_v60  ;;  %v3065_v60 = vld [vmem:[#allocation12 + $0x164] ss:$8 sps:$4 sm:$0xff]  }
 0x137   :  { %1493 = vmatpush1.bf16.msra.mxu0 %v2968_v20  ;;  %v3063_v20 = vld [vmem:[#allocation12 + $0x160] ss:$8 sps:$4 sm:$0xff]  }
 0x138   :  { %1494 = vmatprep.subr.bf16.mxu0 %v2976_v21  ;;  %v640_v21 = vld [vmem:[#allocation3] sm:$0x11] }
 0x13b   :  { %1495 = vmatpush1.bf16.msra.mxu0 %v2974_v33  ;;  %v643_v33 = vld [vmem:[#allocation3 + $0x8] sm:$0x11] }
 0x13c   :  { %1496 = vmatprep.subr.bf16.mxu0 %v2982_v22  ;;  %v3068_v22 = vld [vmem:[#allocation12 + $0x174] ss:$8 sps:$4 sm:$0xff]  }
 0x13f   :  { %1497 = vmatpush1.bf16.msra.mxu0 %v2980_v23  ;;  %v641_v23 = vsel %vm3507_vm10, 0, %v640_v21 }
 0x140   :  { %1498 = vmatprep.subr.bf16.mxu0 %v2988_v27  ;;  %v644_v27 = vsel %vm3850_vm0, 0, %v643_v33  ;;  %642 = vst [vmem:[#allocation3] sm:$0x11] %v641_v23  ;;  %vm1592_vm0 = vsmask.f32 4368 }
 0x141   :  { %645 = vst [vmem:[#allocation3 + $0x8] sm:$0x11] %v644_v27 }
 0x143   :  { %1499 = vmatpush1.bf16.msra.mxu0 %v2986_v13  ;;  %v3066_v13 = vld [vmem:[#allocation12 + $0x170] ss:$8 sps:$4 sm:$0xff]  }
 0x144   :  { %1500 = vmatprep.subr.bf16.mxu0 %v2994_v14  ;;  %v686_v14 = vld [vmem:[#allocation3 + $0x8] sm:$0x22] }
 0x147   :  { %1501 = vmatpush1.bf16.msra.mxu0 %v2992_v28  ;;  %v687_v28 = vsel %vm3851_vm6, 0, %v686_v14  ;;  %vm3857_vm6 = vsmask.f32 256 }
 0x148   :  { %1502 = vmatprep.subr.bf16.mxu0 %v3000_v30  ;;  %688 = vst [vmem:[#allocation3 + $0x8] sm:$0x22] %v687_v28  ;;  %vm1593_vm8 = vmor %vm3857_vm6, %vm1592_vm0 }
 0x14b   :  { %1503 = vmatpush1.bf16.msra.mxu0 %v2998_v31  ;;  %v3071_v31 = vld [vmem:[#allocation12 + $0x184] ss:$8 sps:$4 sm:$0xff]  }
 0x14c   :  { %1504 = vmatprep.subr.bf16.mxu0 %v3006_v32  ;;  %v3069_v32 = vld [vmem:[#allocation12 + $0x180] ss:$8 sps:$4 sm:$0xff]  }
 0x14f   :  { %1505 = vmatpush1.bf16.msra.mxu0 %v3004_v34 }
 0x150   :  { %1506 = vmatprep.subr.bf16.mxu0 %v3012_v35  ;;  %v3074_v35 = vld [vmem:[#allocation12 + $0x194] ss:$8 sps:$4 sm:$0xff]  }
 0x153   :  { %1507 = vmatpush1.bf16.msra.mxu0 %v3010_v36  ;;  %v3072_v36 = vld [vmem:[#allocation12 + $0x190] ss:$8 sps:$4 sm:$0xff]  }
 0x154   :  { %1508 = vmatprep.subr.bf16.mxu0 %v3018_v38  ;;  %v689_v38 = vld [vmem:[#allocation3 + $0x10] sm:$0x22] }
 0x155   :  { %v690_v45 = vsel %vm3853_vm9, 0, %v689_v38 }
 0x156   :  { %691 = vst [vmem:[#allocation3 + $0x10] sm:$0x22] %v690_v45  ;;  %v1612_v45 = vld [vmem:[#allocation3 + $0x8] sm:$0xee] }
 0x157   :  { %1509 = vmatpush1.bf16.msra.mxu0 %v3016_v39  ;;  %v3075_v39 = vld [vmem:[#allocation12 + $0x1a0] ss:$8 sps:$4 sm:$0xff]  }
 0x15a   :  { %1511 = vmatmul.mubr.bf16.vlgmr.msra.gmra.mrb[4].mxu0 %v3679_v58  ;;  %v145_v58 = vrot.slane %v136_v44, %v3694_v46  ;;  %v3083_v44 = vld [vmem:[#allocation12 + $0x1c4] ss:$8 sps:$4 sm:$0xff]  }
 0x15b   :  { %1520 = vmatprep.mubr.bf16.mxu0 %v1312_v50 }
 0x162   :  { %1521 = vmatmul.mubr.bf16.gmra.mrb[16].mxu0 %v1309_v55 }
 0x16d   :  { %v352_v49 = vpop.f32.mrb[0].mxu0 }
 0x16e   :  { %v353_v24 = vadd.f32 %v352_v49, %v141_v48  ;;  %v354_v50 = vpop.f32.mrb[1].mxu0  ;;  %v3086_v49 = vld [vmem:[#allocation12 + $0x1d4] ss:$8 sps:$4 sm:$0xff]  }
 0x16f   :  { %v355_v51 = vadd.f32 %v354_v50, %v145_v58  ;;  %v356_v52 = vpop.f32.mrb[2].mxu0  ;;  %v3090_v50 = vld [vmem:[#allocation12 + $0x1f0] ss:$8 sps:$4 sm:$0xff]  }
 0x170   :  { %v361_v12 = vmax.f32 %v353_v24, 0.0  ;;  %v357_v55 = vadd.f32 %v356_v52, %v141_v48  ;;  %v358_v54 = vpop.f32.mrb[3].mxu0  ;;  %v3081_v48 = vld [vmem:[#allocation12 + $0x1c0] ss:$8 sps:$4 sm:$0xff]   ;;  %v3092_v24 = vld [vmem:[#allocation12 + $0x1f4] ss:$8 sps:$4 sm:$0xff]  }
 0x171   :  { %v359_v56 = vadd.f32 %v358_v54, %v145_v58  ;;  %v362_v59 = vmax.f32 %v355_v51, 0.0  ;;  %v3084_v58 = vld [vmem:[#allocation12 + $0x1d0] ss:$8 sps:$4 sm:$0xff]   ;;  %v3096_v51 = vld [vmem:[#allocation12 + $0x4] ss:$8 sps:$4 sm:$0xff]  }
 0x172   :  { %v363_v19 = vmax.f32 %v357_v55, 0.0 }
 0x173   :  { %v364_v61 = vmax.f32 %v359_v56, 0.0 }
 0x174   :  { %v365_v62 = vpack.c.bf16 %v363_v19, %v361_v12 }
 0x175   :  { %v366_v0 = vpack.c.bf16 %v364_v61, %v362_v59  ;;  %v1535_v59 = vld [vmem:[%s3804_s6] sm:$0x3] }
 0x176   :  { %v1540_v61 = vrot.slane %v1535_v59, %v3689_v43 }
 0x177   :  { %603 = vmatprep.mubr.bf16.mxu1 %v366_v0 }
 0x178   :  { %604 = vmatmul.mubr.bf16.vlgmr.msra.gmra.mrb[0].mxu1 %v365_v62  ;;  %v1544_v62 = vrot.slane %v1535_v59, %v3694_v46 }
 0x179   :  { %1895 = vmatpush1.bf16.msra.mxu1 %v3045_v2 }
 0x17a   :  { %1896 = vmatprep.subr.bf16.mxu1 %v3050_v6 }
 0x17d   :  { %1897 = vmatpush1.bf16.msra.mxu1 %v3048_v8 }
 0x17e   :  { %1898 = vmatprep.subr.bf16.mxu1 %v3053_v9 }
 0x181   :  { %1899 = vmatpush1.bf16.msra.mxu1 %v3051_v10 }
 0x182   :  { %1900 = vmatprep.subr.bf16.mxu1 %v3056_v11 }
 0x185   :  { %1901 = vmatpush1.bf16.msra.mxu1 %v3054_v15 }
 0x186   :  { %1902 = vmatprep.subr.bf16.mxu1 %v3059_v7 }
 0x189   :  { %1903 = vmatpush1.bf16.msra.mxu1 %v3057_v16 }
 0x18a   :  { %1904 = vmatprep.subr.bf16.mxu1 %v3062_v17 }
 0x18d   :  { %1905 = vmatpush1.bf16.msra.mxu1 %v3060_v18 }
 0x18e   :  { %1906 = vmatprep.subr.bf16.mxu1 %v3065_v60 }
 0x191   :  { %1907 = vmatpush1.bf16.msra.mxu1 %v3063_v20 }
 0x192   :  { %1908 = vmatprep.subr.bf16.mxu1 %v3068_v22 }
 0x195   :  { %1909 = vmatpush1.bf16.msra.mxu1 %v3066_v13 }
 0x196   :  { %1910 = vmatprep.subr.bf16.mxu1 %v3071_v31  ;;  %v1581_v31 = vld [vmem:[#allocation3 + $0x8] sm:$0x11] }
 0x199   :  { %1911 = vmatpush1.bf16.msra.mxu1 %v3069_v32 }
 0x19a   :  { %1912 = vmatprep.subr.bf16.mxu1 %v3074_v35 }
 0x19d   :  { %1913 = vmatpush1.bf16.msra.mxu1 %v3072_v36 }
 0x19e   :  { %1914 = vmatprep.subr.bf16.mxu1 %v3077_v47 }
 0x1a1   :  { %1915 = vmatpush1.bf16.msra.mxu1 %v3075_v39 }
 0x1a2   :  { %1916 = vmatprep.subr.bf16.mxu1 %v3080_v41 }
 0x1a5   :  { %1917 = vmatpush1.bf16.msra.mxu1 %v3078_v42 }
 0x1a6   :  { %1918 = vmatprep.subr.bf16.mxu1 %v3083_v44 }
 0x1a9   :  { %1919 = vmatpush1.bf16.msra.mxu1 %v3081_v48 }
 0x1aa   :  { %1920 = vmatprep.subr.bf16.mxu1 %v3086_v49 }
 0x1ad   :  { %1921 = vmatpush1.bf16.msra.mxu1 %v3084_v58 }
 0x1ae   :  { %1922 = vmatprep.subr.bf16.mxu1 %v3089_v53 }
 0x1b1   :  { %1923 = vmatpush1.bf16.msra.mxu1 %v3087_v57  ;;  %v1615_v57 = vld [vmem:[#allocation3 + $0x10] sm:$0x33] }
 0x1b2   :  { %1924 = vmatprep.subr.bf16.mxu1 %v3092_v24  ;;  %v399_v24 = vld [vmem:[%s3802_s4] sm:$0x3] }
 0x1b5   :  { %v1041_v30 = vpop.f32.mrb[8].mxu0  ;;  %1925 = vmatpush1.bf16.msra.mxu1 %v3090_v50 }
 0x1b6   :  { %v1043_v26 = vpop.f32.mrb[9].mxu0  ;;  %2114 = vmatprep.subr.bf16.mxu1 %v3096_v51 }
 0x1b7   :  { %v1045_v25 = vpop.f32.mrb[10].mxu0 }
 0x1b8   :  { %v1046_v34 = vpop.f32.mrb[11].mxu0 }
 0x1f5   :  { %v1261_v52 = vpop.f32.mrb[12].mxu0 }
 0x1f6   :  { %v1262_v12 = vadd.f32 %v1261_v52, %v1041_v30  ;;  %v1263_v55 = vpop.f32.mrb[13].mxu0  ;;  %v1578_v30 = vld [vmem:[#allocation3] sm:$0xff]  ;;  %v404_v52 = vrot.slane %v399_v24, %v3689_v43 }
 0x1f7   :  { %v1264_v54 = vadd.f32 %v1263_v55, %v1043_v26  ;;  %v1265_v56 = vpop.f32.mrb[14].mxu0  ;;  %v408_v55 = vrot.slane %v399_v24, %v3694_v46  ;;  %v3113_v24 = vld [vmem:[#allocation12 + $0x60] ss:$8 sps:$4 sm:$0xff]  }
 0x1f8   :  { %v1266_v19 = vpop.f32.mrb[15].mxu0 }
 0x22d   :  { %v1512_v0 = vpop.f32.mrb[4].mxu0 }
 0x22e   :  { %v1547_v2 = vadd.f32 %v1540_v61, %v1512_v0  ;;  %v1514_v3 = vpop.f32.mrb[5].mxu0 }
 0x22f   :  { %v1548_v6 = vadd.f32 %v1544_v62, %v1514_v3  ;;  %v1516_v8 = vpop.f32.mrb[6].mxu0 }
 0x230   :  { %v1553_v9 = vmax.f32 %v1547_v2, 0.0  ;;  %v1549_v10 = vadd.f32 %v1540_v61, %v1516_v8  ;;  %v1518_v11 = vpop.f32.mrb[7].mxu0 }
 0x231   :  { %v1554_v15 = vmax.f32 %v1548_v6, 0.0  ;;  %v1550_v7 = vadd.f32 %v1544_v62, %v1518_v11 }
 0x232   :  { %v1555_v16 = vmax.f32 %v1549_v10, 0.0 }
 0x233   :  { %v2768_v17 = vpack.c.bf16 %v1554_v15, %v1553_v9  ;;  %v1556_v18 = vmax.f32 %v1550_v7, 0.0 }
 0x235   :  { %v1569_v60 = vshrl.u32 %v2768_v17, 16  ;;  %v2769_v20 = vpack.c.bf16 %v1556_v18, %v1555_v16  ;;  %v1522_v21 = vpop.f32.mrb[16].mxu0  ;;  %v1572_v27 = vshll.u32 %v2768_v17, 16 }
 0x236   :  { %v1533_v33 = vadd.f32 %v1522_v21, %v1262_v12  ;;  %v1524_v22 = vpop.f32.mrb[17].mxu0 }
 0x237   :  { %v1571_v23 = vrot.slane %v1569_v60, 7  ;;  %v1595_v13 = vshrl.u32 %v2769_v20, 16  ;;  %v1534_v14 = vadd.f32 %v1524_v22, %v1264_v54  ;;  %v1526_v28 = vpop.f32.mrb[18].mxu0  ;;  %v1598_v26 = vshll.u32 %v2769_v20, 16 }
 0x238   :  { %v1551_v32 = vadd.f32 %v1540_v61, %v1533_v33  ;;  %v1527_v25 = vpop.f32.mrb[19].mxu0 }
 0x239   :  { %v1574_v34 = vor.u32 %v1572_v27, %v1571_v23  ;;  %v1575_v35 = vrot.slane %v1571_v23, 4  ;;  %v1597_v36 = vrot.slane %v1595_v13, 7  ;;  %v1552_v38 = vadd.f32 %v1544_v62, %v1534_v14  ;;  %v3094_v25 = vld [vmem:[#allocation12] ss:$8 sps:$4 sm:$0xff]  }
 0x23a   :  { %v1557_v47 = vmax.f32 %v1551_v32, 0.0 }
 0x23b   :  { %v1579_v39 = vsel %vm3856_vm12, %v1574_v34, %v1578_v30  ;;  %v1582_v41 = vsel %vm3507_vm10, %v1575_v35, %v1581_v31  ;;  %v1600_v42 = vor.u32 %v1598_v26, %v1597_v36  ;;  %v1558_v44 = vmax.f32 %v1552_v38, 0.0 }
 0x23c   :  { %1580 = vst [vmem:[#allocation3] sm:$0xff] %v1579_v39  ;;  %1583 = vst [vmem:[#allocation3 + $0x8] sm:$0x11] %v1582_v41  ;;  %v1601_v29 = vrot.slane %v1597_v36, 4  ;;  %v3103_v41 = vld [vmem:[#allocation12 + $0x24] ss:$8 sps:$4 sm:$0xff]  }
 0x23d   :  { %v1613_v48 = vsel %vm708_vm4, %v1600_v42, %v1612_v45  ;;  %v2770_v58 = vpack.c.bf16 %v1558_v44, %v1557_v47  ;;  %v3100_v47 = vld [vmem:[#allocation12 + $0x14] ss:$8 sps:$4 sm:$0xff]   ;;  %v3101_v44 = vld [vmem:[#allocation12 + $0x20] ss:$8 sps:$4 sm:$0xff]   ;;  %vm2461_vm10 = vcmask 1045504  }
 0x23e   :  { %1614 = vst [vmem:[#allocation3 + $0x8] sm:$0xee] %v1613_v48 }
 0x23f   :  { %v1603_v40 = vshrl.u32 %v2770_v58, 16  ;;  %v1606_v49 = vshll.u32 %v2770_v58, 16  ;;  %v3106_v58 = vld [vmem:[#allocation12 + $0x34] ss:$8 sps:$4 sm:$0xff]  }
 0x241   :  { %v1605_v37 = vrot.slane %v1603_v40, 7  ;;  %v3104_v40 = vld [vmem:[#allocation12 + $0x30] ss:$8 sps:$4 sm:$0xff]  }
 0x243   :  { %v1608_v53 = vor.u32 %v1606_v49, %v1605_v37  ;;  %v2165_v62 = vld [vmem:[#allocation3] sm:$0xee]  ;;  %v3109_v37 = vld [vmem:[#allocation12 + $0x44] ss:$8 sps:$4 sm:$0xff]   ;;  %v3107_v49 = vld [vmem:[#allocation12 + $0x40] ss:$8 sps:$4 sm:$0xff]  }
 0x245   :  { %v1619_v1 = vld [vmem:[#allocation3 + $0x8] sm:$0xff]  ;;  %v1609_v50 = vsel %vm1593_vm8, %v1601_v29, %v1608_v53  ;;  %v3112_v29 = vld [vmem:[#allocation12 + $0x54] ss:$8 sps:$4 sm:$0xff]   ;;  %v3110_v53 = vld [vmem:[#allocation12 + $0x50] ss:$8 sps:$4 sm:$0xff]  }
 0x246   :  { %v1616_v63 = vsel %vm716_vm13, %v1609_v50, %v1615_v57  ;;  %v3741_v51 = vcombine.high %v1579_v39, %v1619_v1  ;;  %v3744_v12 = vcombine.low %v1579_v39, %v1619_v1  ;;  %v2734_v6 = vcombine.low %v2165_v62, %v1619_v1  ;;  %v3098_v39 = vld [vmem:[#allocation12 + $0x10] ss:$8 sps:$4 sm:$0xff]   ;;  %v3115_v57 = vld [vmem:[#allocation12 + $0x64] ss:$8 sps:$4 sm:$0xff]  }
 0x247   :  { %1617 = vst [vmem:[#allocation3 + $0x10] sm:$0x33] %v1616_v63  ;;  %v2735_v15 = vcombine.high %v2165_v62, %v1619_v1  ;;  %v3118_v1 = vld [vmem:[#allocation12 + $0x74] ss:$8 sps:$4 sm:$0xff]   ;;  %v3116_v50 = vld [vmem:[#allocation12 + $0x70] ss:$8 sps:$4 sm:$0xff]  }
 0x248   :  { %v1715_v56 = vshll.u32 %v3741_v51, 16  ;;  %v1703_v5 = vshll.u32 %v3744_v12, 16  ;;  %v1713_v20 = vshrl.u32 %v3741_v51, 16  ;;  %v1701_v33 = vshrl.u32 %v3744_v12, 16  ;;  %v3121_v63 = vld [vmem:[#allocation12 + $0x84] ss:$8 sps:$4 sm:$0xff]  }
 0x249   :  { %v2204_v23 = vrot.slane %v2734_v6, 1  ;;  %v2207_v13 = vrot.slane %v2735_v15, 1  ;;  %v3134_v62 = vld [vmem:[#allocation12 + $0xd0] ss:$8 sps:$4 sm:$0xff]  }
 0x24a   :  { %v1717_v11 = vrot.slane %v1715_v56, 1  ;;  %v1705_v18 = vrot.slane %v1703_v5, 1  ;;  %v3125_v56 = vld [vmem:[#allocation12 + $0xa0] ss:$8 sps:$4 sm:$0xff]   ;;  %v3133_v5 = vld [vmem:[#allocation12 + $0xc4] ss:$8 sps:$4 sm:$0xff]  }
 0x24b   :  { %v605_v54 = vpop.f32.mrb[0].mxu1  ;;  %v3140_v6 = vld [vmem:[#allocation12 + $0xf0] ss:$8 sps:$4 sm:$0xff]  }
 0x24c   :  { %v606_v19 = vadd.f32 %v605_v54, %v404_v52  ;;  %v607_v59 = vpop.f32.mrb[1].mxu1  ;;  %v1718_v27 = vor.u32 %v1717_v11, %v1713_v20  ;;  %v1706_v31 = vor.u32 %v1705_v18, %v1701_v33  ;;  %v3127_v54 = vld [vmem:[#allocation12 + $0xa4] ss:$8 sps:$4 sm:$0xff]   ;;  %v3149_v11 = vld [vmem:[#allocation12 + $0x214] ss:$8 sps:$4 sm:$0xff]  }
 0x24d   :  { %v608_v61 = vadd.f32 %v607_v59, %v408_v55  ;;  %v609_v4 = vpop.f32.mrb[2].mxu1  ;;  %v3128_v59 = vld [vmem:[#allocation12 + $0xb0] ss:$8 sps:$4 sm:$0xff]   ;;  %v3153_v18 = vld [vmem:[#allocation12 + $0x224] ss:$8 sps:$4 sm:$0xff]  }
 0x24e   :  { %v614_v0 = vmax.f32 %v606_v19, 0.0  ;;  %v610_v2 = vadd.f32 %v609_v4, %v404_v52  ;;  %v611_v3 = vpop.f32.mrb[3].mxu1  ;;  %v1653_v10 = vld [vmem:[#allocation3 + $0x10] sm:$0x33]  ;;  %v3124_v52 = vld [vmem:[#allocation12 + $0x94] ss:$8 sps:$4 sm:$0xff]  }
 0x24f   :  { %v615_v8 = vmax.f32 %v608_v61, 0.0  ;;  %v612_v9 = vadd.f32 %v611_v3, %v408_v55  ;;  %v3749_v16 = vcombine.high %v1653_v10, %v1653_v10  ;;  %v3751_v17 = vcombine.low %v1653_v10, %v1653_v10  ;;  %v3122_v55 = vld [vmem:[#allocation12 + $0x90] ss:$8 sps:$4 sm:$0xff]   ;;  %v3130_v19 = vld [vmem:[#allocation12 + $0xb4] ss:$8 sps:$4 sm:$0xff]  }
 0x250   :  { %618 = vst [vmem:[#allocation13] sm:$0xff] %v614_v0  ;;  %v616_v7 = vmax.f32 %v610_v2, 0.0  ;;  %v3131_v61 = vld [vmem:[#allocation12 + $0xc0] ss:$8 sps:$4 sm:$0xff]   ;;  %v3136_v4 = vld [vmem:[#allocation12 + $0xd4] ss:$8 sps:$4 sm:$0xff]  }
 0x251   :  { %619 = vst [vmem:[#allocation13 + $0x8] sm:$0xff] %v615_v8  ;;  %v617_v60 = vmax.f32 %v612_v9, 0.0  ;;  %v1720_v21 = vshll.u32 %v3749_v16, 16  ;;  %v1708_v22 = vshll.u32 %v3751_v17, 16  ;;  %v2208_v14 = vrot.slane %v3749_v16, 1 }
 0x252   :  { %620 = vst [vmem:[#allocation13 + $0x20] sm:$0xff] %v616_v7  ;;  %v2205_v28 = vrot.slane %v3751_v17, 1  ;;  %v1727_v32 = vshrl.u32 %v3749_v16, 16  ;;  %v1724_v42 = vshrl.u32 %v3751_v17, 16  ;;  %v3139_v0 = vld [vmem:[#allocation12 + $0xe4] ss:$8 sps:$4 sm:$0xff]  }
 0x253   :  { %621 = vst [vmem:[#allocation13 + $0x28] sm:$0xff] %v617_v60  ;;  %v1722_v30 = vrot.slane %v1720_v21, 1  ;;  %v1710_v26 = vrot.slane %v1708_v22, 1  ;;  %v3763_v34 = vsel %vm1307_vm3, %v2207_v13, %v2208_v14  ;;  %v3137_v2 = vld [vmem:[#allocation12 + $0xe0] ss:$8 sps:$4 sm:$0xff]  }
 0x254   :  { %v3768_v35 = vsel %vm1307_vm3, %v2204_v23, %v2205_v28  ;;  %v3142_v3 = vld [vmem:[#allocation12 + $0xf4] ss:$8 sps:$4 sm:$0xff]   ;;  %v3145_v8 = vld [vmem:[#allocation12 + $0x204] ss:$8 sps:$4 sm:$0xff]   ;;  %v3143_v10 = vld [vmem:[#allocation12 + $0x200] ss:$8 sps:$4 sm:$0xff]  }
 0x255   :  { %v1723_v36 = vsel %vm802_vm11, %v1718_v27, %v1722_v30  ;;  %v1711_v38 = vsel %vm802_vm11, %v1706_v31, %v1710_v26  ;;  %v1729_v45 = vor.u32 %v1727_v32, %v1722_v30  ;;  %v1726_v48 = vor.u32 %v1724_v42, %v1710_v26  ;;  %v1620_v9 = vld [vmem:[#allocation3 + $0x10] sm:$0x11]  ;;  %v3147_v7 = vld [vmem:[#allocation12 + $0x210] ss:$8 sps:$4 sm:$0xff]   ;;  %v3158_v21 = vld [vmem:[#allocation12 + $0x234] ss:$8 sps:$4 sm:$0xff]  }
 0x256   :  { %1926 = vmatprep.mubr.bf16.mxu1 %v1723_v36  ;;  %v2701_v15 = vcombine.high %v1620_v9, %v1620_v9  ;;  %v3151_v60 = vld [vmem:[#allocation12 + $0x220] ss:$8 sps:$4 sm:$0xff]   ;;  %v2700_v20 = vcombine.low %v1620_v9, %v1620_v9  ;;  %v3156_v33 = vld [vmem:[#allocation12 + $0x230] ss:$8 sps:$4 sm:$0xff]   ;;  %v3161_v22 = vld [vmem:[#allocation12 + $0x244] ss:$8 sps:$4 sm:$0xff]  }
 0x257   :  { %1927 = vmatmul.mubr.bf16.vlgmr.msra.gmra.mrb[4].mxu1 %v1711_v38  ;;  %v3159_v23 = vld [vmem:[#allocation12 + $0x240] ss:$8 sps:$4 sm:$0xff]   ;;  %v3162_v27 = vld [vmem:[#allocation12 + $0x250] ss:$8 sps:$4 sm:$0xff]   ;;  %v3167_v13 = vld [vmem:[#allocation12 + $0x264] ss:$8 sps:$4 sm:$0xff]  }
 0x258   :  { %2115 = vmatpush1.bf16.msra.mxu1 %v3094_v25  ;;  %1936 = vmatprep.mubr.bf16.mxu1 %v1729_v45  ;;  %v3165_v30 = vld [vmem:[#allocation12 + $0x260] ss:$8 sps:$4 sm:$0xff]   ;;  %v3170_v31 = vld [vmem:[#allocation12 + $0x274] ss:$8 sps:$4 sm:$0xff]   ;;  %v3168_v26 = vld [vmem:[#allocation12 + $0x270] ss:$8 sps:$4 sm:$0xff]  }
 0x259   :  { %2116 = vmatprep.subr.bf16.mxu1 %v3100_v47  ;;  %v3173_v32 = vld [vmem:[#allocation12 + $0x284] ss:$8 sps:$4 sm:$0xff]   ;;  %v3171_v25 = vld [vmem:[#allocation12 + $0x280] ss:$8 sps:$4 sm:$0xff]   ;;  %v3174_v36 = vld [vmem:[#allocation12 + $0x290] ss:$8 sps:$4 sm:$0xff]  }
 0x25a   :  { %v3179_v38 = vld [vmem:[#allocation12 + $0x2a4] ss:$8 sps:$4 sm:$0xff]   ;;  %v3177_v45 = vld [vmem:[#allocation12 + $0x2a0] ss:$8 sps:$4 sm:$0xff]   ;;  %v3182_v47 = vld [vmem:[#allocation12 + $0x2b4] ss:$8 sps:$4 sm:$0xff]  }
 0x25b   :  { %v3183_v42 = vld [vmem:[#allocation12 + $0x2c0] ss:$8 sps:$4 sm:$0xff]  }
 0x25c   :  { %2117 = vmatpush1.bf16.msra.mxu1 %v3098_v39  ;;  %v3180_v39 = vld [vmem:[#allocation12 + $0x2b0] ss:$8 sps:$4 sm:$0xff]  }
 0x25d   :  { %2118 = vmatprep.subr.bf16.mxu1 %v3103_v41  ;;  %v3185_v41 = vld [vmem:[#allocation12 + $0x2c4] ss:$8 sps:$4 sm:$0xff]  }
 0x25f   :  { %1937 = vmatmul.mubr.bf16.gmra.mrb[8].mxu1 %v1726_v48  ;;  %v3186_v48 = vld [vmem:[#allocation12 + $0x2d0] ss:$8 sps:$4 sm:$0xff]  }
 0x260   :  { %2119 = vmatpush1.bf16.msra.mxu1 %v3101_v44  ;;  %2146 = vmatprep.mubr.bf16.mxu1 %v3741_v51  ;;  %v3119_v51 = vld [vmem:[#allocation12 + $0x80] ss:$8 sps:$4 sm:$0xff]   ;;  %v3188_v44 = vld [vmem:[#allocation12 + $0x2d4] ss:$8 sps:$4 sm:$0xff]  }
 0x261   :  { %2120 = vmatprep.subr.bf16.mxu1 %v3106_v58  ;;  %v3191_v58 = vld [vmem:[#allocation12 + $0x2e4] ss:$8 sps:$4 sm:$0xff]  }
 0x264   :  { %2121 = vmatpush1.bf16.msra.mxu1 %v3104_v40  ;;  %v3189_v40 = vld [vmem:[#allocation12 + $0x2e0] ss:$8 sps:$4 sm:$0xff]  }
 0x265   :  { %2122 = vmatprep.subr.bf16.mxu1 %v3109_v37  ;;  %v3194_v37 = vld [vmem:[#allocation12 + $0x2f4] ss:$8 sps:$4 sm:$0xff]  }
 0x268   :  { %2123 = vmatpush1.bf16.msra.mxu1 %v3107_v49  ;;  %v3192_v49 = vld [vmem:[#allocation12 + $0x2f0] ss:$8 sps:$4 sm:$0xff]  }
 0x269   :  { %2124 = vmatprep.subr.bf16.mxu1 %v3112_v29 }
 0x26c   :  { %2125 = vmatpush1.bf16.msra.mxu1 %v3110_v53 }
 0x26d   :  { %2126 = vmatprep.subr.bf16.mxu1 %v3115_v57 }
 0x270   :  { %2127 = vmatpush1.bf16.msra.mxu1 %v3113_v24 }
 0x271   :  { %2128 = vmatprep.subr.bf16.mxu1 %v3118_v1 }
 0x274   :  { %2129 = vmatpush1.bf16.msra.mxu1 %v3116_v50 }
 0x275   :  { %2130 = vmatprep.subr.bf16.mxu1 %v3121_v63 }
 0x278   :  { %2131 = vmatpush1.bf16.msra.mxu1 %v3119_v51 }
 0x279   :  { %2132 = vmatprep.subr.bf16.mxu1 %v3124_v52 }
 0x27c   :  { %2133 = vmatpush1.bf16.msra.mxu1 %v3122_v55 }
 0x27d   :  { %2134 = vmatprep.subr.bf16.mxu1 %v3127_v54 }
 0x280   :  { %2135 = vmatpush1.bf16.msra.mxu1 %v3125_v56 }
 0x281   :  { %2136 = vmatprep.subr.bf16.mxu1 %v3130_v19 }
 0x284   :  { %2137 = vmatpush1.bf16.msra.mxu1 %v3128_v59 }
 0x285   :  { %2138 = vmatprep.subr.bf16.mxu1 %v3133_v5 }
 0x288   :  { %2139 = vmatpush1.bf16.msra.mxu1 %v3131_v61 }
 0x289   :  { %2140 = vmatprep.subr.bf16.mxu1 %v3136_v4 }
 0x28c   :  { %2141 = vmatpush1.bf16.msra.mxu1 %v3134_v62 }
 0x28d   :  { %2142 = vmatprep.subr.bf16.mxu1 %v3139_v0 }
 0x290   :  { %2143 = vmatpush1.bf16.msra.mxu1 %v3137_v2 }
 0x291   :  { %2144 = vmatprep.subr.bf16.mxu1 %v3142_v3 }
 0x294   :  { %2145 = vmatpush1.bf16.msra.mxu1 %v3140_v6 }
 0x295   :  { %2374 = vmatprep.subr.bf16.mxu1 %v3145_v8 }
 0x297   :  { %2147 = vmatmul.mubr.bf16.vlgmr.msra.gmra.mrb[4].mxu1 %v3744_v12  ;;  %v3164_v12 = vld [vmem:[#allocation12 + $0x254] ss:$8 sps:$4 sm:$0xff]  }
 0x298   :  { %2156 = vmatprep.mubr.bf16.mxu1 %v2701_v15  ;;  %2375 = vmatpush1.bf16.msra.mxu1 %v3143_v10 }
 0x299   :  { %2376 = vmatprep.subr.bf16.mxu1 %v3149_v11 }
 0x29c   :  { %2377 = vmatpush1.bf16.msra.mxu1 %v3147_v7 }
 0x29d   :  { %2378 = vmatprep.subr.bf16.mxu1 %v3153_v18 }
 0x29f   :  { %2157 = vmatmul.mubr.bf16.gmra.mrb[12].mxu1 %v2700_v20 }
 0x2a0   :  { %2379 = vmatpush1.bf16.msra.mxu1 %v3151_v60  ;;  %2406 = vmatprep.mubr.bf16.mxu1 %v3763_v34  ;;  %v3176_v34 = vld [vmem:[#allocation12 + $0x294] ss:$8 sps:$4 sm:$0xff]  }
 0x2a1   :  { %2380 = vmatprep.subr.bf16.mxu1 %v3158_v21 }
 0x2a4   :  { %2381 = vmatpush1.bf16.msra.mxu1 %v3156_v33 }
 0x2a5   :  { %2382 = vmatprep.subr.bf16.mxu1 %v3161_v22 }
 0x2a8   :  { %2383 = vmatpush1.bf16.msra.mxu1 %v3159_v23 }
 0x2a9   :  { %2384 = vmatprep.subr.bf16.mxu1 %v3164_v12 }
 0x2ac   :  { %2385 = vmatpush1.bf16.msra.mxu1 %v3162_v27 }
 0x2ad   :  { %2386 = vmatprep.subr.bf16.mxu1 %v3167_v13 }
 0x2b0   :  { %2387 = vmatpush1.bf16.msra.mxu1 %v3165_v30 }
 0x2b1   :  { %2388 = vmatprep.subr.bf16.mxu1 %v3170_v31 }
 0x2b4   :  { %2389 = vmatpush1.bf16.msra.mxu1 %v3168_v26 }
 0x2b5   :  { %2390 = vmatprep.subr.bf16.mxu1 %v3173_v32 }
 0x2b8   :  { %2391 = vmatpush1.bf16.msra.mxu1 %v3171_v25 }
 0x2b9   :  { %2392 = vmatprep.subr.bf16.mxu1 %v3176_v34 }
 0x2bc   :  { %2393 = vmatpush1.bf16.msra.mxu1 %v3174_v36 }
 0x2bd   :  { %2394 = vmatprep.subr.bf16.mxu1 %v3179_v38 }
 0x2c0   :  { %2395 = vmatpush1.bf16.msra.mxu1 %v3177_v45 }
 0x2c1   :  { %2396 = vmatprep.subr.bf16.mxu1 %v3182_v47 }
 0x2c4   :  { %2397 = vmatpush1.bf16.msra.mxu1 %v3180_v39 }
 0x2c5   :  { %2398 = vmatprep.subr.bf16.mxu1 %v3185_v41 }
 0x2c8   :  { %2399 = vmatpush1.bf16.msra.mxu1 %v3183_v42 }
 0x2c9   :  { %2400 = vmatprep.subr.bf16.mxu1 %v3188_v44 }
 0x2cc   :  { %2401 = vmatpush1.bf16.msra.mxu1 %v3186_v48 }
 0x2cd   :  { %2402 = vmatprep.subr.bf16.mxu1 %v3191_v58 }
 0x2d0   :  { %2403 = vmatpush1.bf16.msra.mxu1 %v3189_v40 }
 0x2d1   :  { %2404 = vmatprep.subr.bf16.mxu1 %v3194_v37 }
 0x2d4   :  { %2405 = vmatpush1.bf16.msra.mxu1 %v3192_v49 }
 0x2d7   :  { %2407 = vmatmul.mubr.bf16.vlgmr.msra.gmra.mrb[4].mxu1 %v3768_v35  ;;  %v2431_v35 = vld [vmem:[%s3806_s8] sm:$0x3]  ;;  %s3342_s8 = smov [#allocation13]  }
 0x2d8   :  { %2416 = vmatprep.mubr.bf16.mxu1 %v2208_v14  ;;  %v2436_v16 = vrot.slane %v2431_v35, %v3689_v43  ;;  %v2440_v14 = vrot.slane %v2431_v35, %v3694_v46  ;;  %s2477_s29 = sshll.u32 %s3342_s8, 4  ;;  %s2478_s29 = int_to_ptr.vmem [resolvable:$true] %s2477_s29 }
 0x2d9   :  { %s3305_s30 = scalar_lea.vmem %s2478_s29, 1024  ;;  %p3310_p13 = scmp.lt.s32.totalorder %s2478_s29, %s2478_s29 }
 0x2da   :  { %p3306_p12 = scmp.ne.s32.totalorder %s2478_s29, %s3305_s30  ;;  %p3311_p0 = scmp.lt.s32.totalorder %s3305_s30, %s3305_s30 }
 0x2dc   :  { %p3312_p1 = por %p3311_p0, %p3310_p13 }
 0x2de   :  { %p3313_p2 = pnand %p3312_p1, %p3306_p12 }
 0x2df   :  { %2417 = vmatmul.mubr.bf16.gmra.mrb[16].mxu1 %v2205_v28 }
 0x332   :  { %v1938_v29 = vpop.f32.mrb[8].mxu1 }
 0x333   :  { %v1940_v53 = vpop.f32.mrb[9].mxu1 }
 0x334   :  { %v1942_v57 = vpop.f32.mrb[10].mxu1 }
 0x335   :  { %v1943_v24 = vpop.f32.mrb[11].mxu1 }
 0x372   :  { %v2158_v1 = vpop.f32.mrb[12].mxu1 }
 0x373   :  { %v2159_v50 = vadd.f32 %v2158_v1, %v1938_v29  ;;  %v2160_v63 = vpop.f32.mrb[13].mxu1 }
 0x374   :  { %v2161_v51 = vadd.f32 %v2160_v63, %v1940_v53  ;;  %v2162_v52 = vpop.f32.mrb[14].mxu1 }
 0x375   :  { %v2163_v55 = vpop.f32.mrb[15].mxu1 }
 0x3aa   :  { %v2408_v17 = vpop.f32.mrb[4].mxu1 }
 0x3ab   :  { %v2443_v28 = vadd.f32 %v2436_v16, %v2408_v17  ;;  %v2410_v54 = vpop.f32.mrb[5].mxu1 }
 0x3ac   :  { %v2444_v56 = vadd.f32 %v2440_v14, %v2410_v54  ;;  %v2412_v19 = vpop.f32.mrb[6].mxu1 }
 0x3ad   :  { %v2449_v59 = vmax.f32 %v2443_v28, 0.0  ;;  %v2414_v5 = vpop.f32.mrb[7].mxu1  ;;  %v2445_v4 = vadd.f32 %v2436_v16, %v2412_v19 }
 0x3ae   :  { %v2450_v61 = vmax.f32 %v2444_v56, 0.0  ;;  %v2446_v62 = vadd.f32 %v2440_v14, %v2414_v5 }
 0x3af   :  { %2455 = vst [vmem:[#allocation13 + $0x10] sm:$0xff] %v2449_v59  ;;  %v2451_v43 = vmax.f32 %v2445_v4, 0.0 }
 0x3b0   :  { %2456 = vst [vmem:[#allocation13 + $0x18] sm:$0xff] %v2450_v61  ;;  %v2452_v10 = vmax.f32 %v2446_v62, 0.0 }
 0x3b1   :  { %v2462_v18 = vrot.slane %v2451_v43, 2 }
 0x3b2   :  { %v2418_v0 = vpop.f32.mrb[16].mxu1  ;;  %v2465_v20 = vrot.slane %v2452_v10, 2 }
 0x3b3   :  { %v2429_v2 = vadd.f32 %v2418_v0, %v2159_v50  ;;  %v2420_v3 = vpop.f32.mrb[17].mxu1 }
 0x3b4   :  { %v2430_v6 = vadd.f32 %v2420_v3, %v2161_v51  ;;  %v2422_v8 = vpop.f32.mrb[18].mxu1 }
 0x3b5   :  { %v2447_v9 = vadd.f32 %v2436_v16, %v2429_v2  ;;  %v2423_v46 = vpop.f32.mrb[19].mxu1 }
 0x3b6   :  { %v2448_v11 = vadd.f32 %v2440_v14, %v2430_v6 }
 0x3b7   :  { %v2453_v15 = vmax.f32 %v2447_v9, 0.0 }
 0x3b8   :  { %v2454_v7 = vmax.f32 %v2448_v11, 0.0 }
 0x3b9   :  { %v2463_v60 = vrot.slane %v2453_v15, 2 }
 0x3ba   :  { %v2466_v21 = vrot.slane %v2454_v7, 2 }
 0x3bb   :  { %v2464_v33 = vsel %vm2461_vm10, %v2462_v18, %v2463_v60 }
 0x3bc   :  { %2470 = vst [vmem:[#allocation13 + $0x30] sm:$0xff] %v2464_v33  ;;  %v2467_v22 = vsel %vm2461_vm10, %v2465_v20, %v2466_v21 }
 0x3bd   :  { %2471 = vst [vmem:[#allocation13 + $0x38] sm:$0xff] %v2467_v22 }
 0x3be   :  { %3316 = shalt.err (!%p3313_p2)
}
 0x3bf   :  { %s3317_s1 = scalar_lea.hbm %s3807_s9, 1024 }
 0x3c0   :  { %p3318_p3 = scmp.ne.s32.totalorder %s3807_s9, %s3317_s1  ;;  %p3321_p4 = scmp.lt.u32.totalorder %s3317_s1, %s3807_s9 }
 0x3c2   :  { %p3323_p5 = pnand %p3321_p4, %p3318_p3 }
 0x3c4   :  { %3326 = shalt.err (!%p3323_p5)
}
 0x3c5   :  { %s3343_s16 = smov 512   ;;  %s3344_s18 = smov 32  }
 0x3c6   :  { %2483 = dma.vmem_to_hbm [thread:$0]  %s2478_s29, 1024, %s3807_s9, [#allocation6], %s3343_s16, %s3343_s16, %s3344_s18  }
 0x3c7   :  { %3333 = dma.done.wait [#allocation6], 1024  }
 0x3c8   :  { %3334 = vsyncadd [#allocation6], 4294966272 }
 0x3c9   :  { %2487 = vsyncpa [#allocation5], 1 }
 0x3ca   :  { %2488 = vsyncpa [#allocation8], 1 }
 0x3cb   :  { %2489 = vsyncpa [#allocation11], 1 }
 0x3cc   :  { %2490 = vsyncpa [#allocation6], 1 }

</bundles_post_ra>
